<compile_context>
chip_gen: v7x
topology: tpu7x:2x2x1
jax: 0.10.0
libtpu: 0.0.40
codegen_flags: <defaults>
</compile_context>

<pallas_src>
import numpy as np
import jax
import jax.numpy as jnp
from jax import lax
from jax.experimental import pallas as pl
from jax.experimental.pallas import tpu as pltpu


def _round_up(n, m):
    return (n + m - 1) // m * m


# ----------------------------------------------------------------------------
# Kernel 1: fc1 -> leaky_relu -> fc2 -> leaky_relu -> input projection to LSTM gates
# ----------------------------------------------------------------------------
def _gates_kernel(x_ref, w1_ref, b1_ref, w2_ref, b2_ref, wih_ref, brnn_ref, o_ref):
    h = jnp.dot(x_ref[...], w1_ref[...], preferred_element_type=jnp.float32) + b1_ref[...]
    h = jnp.where(h > 0, h, 0.01 * h)                      # leaky_relu (slope 0.01)
    h = jnp.dot(h, w2_ref[...], preferred_element_type=jnp.float32) + b2_ref[...]
    h = jnp.where(h > 0, h, 0.01 * h)
    # gate pre-activations for ALL timesteps (x@W_ih + b_ih + b_hh), hoisted out of
    # the recurrent loop.
    o_ref[...] = (jnp.dot(h, wih_ref[...], preferred_element_type=jnp.float32)
                  + brnn_ref[...])


def _gates_mlp(x, w1, b1, w2, b2, w_ih, b_rnn, row_tile=512):
    """x: (N, Din) -> (N, 4H). Row-tiled, weights resident."""
    N, Din = x.shape
    H4 = w_ih.shape[1]
    tn = min(row_tile, _round_up(N, 8))
    Npad = _round_up(N, tn)
    if Npad != N:
        x = jnp.pad(x, ((0, Npad - N), (0, 0)))
    out = pl.pallas_call(
        _gates_kernel,
        out_shape=jax.ShapeDtypeStruct((Npad, H4), jnp.float32),
        grid=(Npad // tn,),
        in_specs=[
            pl.BlockSpec((tn, Din), lambda i: (i, 0)),
            pl.BlockSpec(w1.shape, lambda i: (0, 0)),
            pl.BlockSpec(b1.shape, lambda i: (0, 0)),
            pl.BlockSpec(w2.shape, lambda i: (0, 0)),
            pl.BlockSpec(b2.shape, lambda i: (0, 0)),
            pl.BlockSpec(w_ih.shape, lambda i: (0, 0)),
            pl.BlockSpec(b_rnn.shape, lambda i: (0, 0)),
        ],
        out_specs=pl.BlockSpec((tn, H4), lambda i: (i, 0)),
        compiler_params=pltpu.CompilerParams(dimension_semantics=("parallel",)),
    )(x, w1, b1, w2, b2, w_ih, b_rnn)
    return out[:N]


# ----------------------------------------------------------------------------
# Kernel 2: masked (packed-sequence) LSTM, whole time loop inside one invocation
# ----------------------------------------------------------------------------
def _lstm_kernel(gates_ref, mask_ref, whh_ref, y_ref, hn_ref, cn_ref):
    """gates_ref: (T, B, 4H) precomputed x@W_ih + biases.  PyTorch gate order i,f,g,o.
    State only updates where mask == 1; padded outputs are zero (pad_packed_sequence)."""
    T = y_ref.shape[0]
    B, H = hn_ref.shape

    def step(t, carry):
        h, c = carry
        g = gates_ref[t] + jnp.dot(h, whh_ref[...], preferred_element_type=jnp.float32)
        # With H a multiple of 128 each slice is whole lane tiles (no XLU extracts).
        i_g = jax.nn.sigmoid(g[:, 0:H])
        f_g = jax.nn.sigmoid(g[:, H:2 * H])
        g_g = jnp.tanh(g[:, 2 * H:3 * H])
        o_g = jax.nn.sigmoid(g[:, 3 * H:4 * H])
        c_new = f_g * c + i_g * g_g
        h_new = o_g * jnp.tanh(c_new)

        valid = mask_ref[t] > 0.0                 # (B, 1) bool
        h_next = jnp.where(valid, h_new, h)       # one vselect per vreg
        c_next = jnp.where(valid, c_new, c)
        y_ref[t] = jnp.where(valid, h_new, 0.0)   # pad_packed_sequence pads with 0
        return (h_next, c_next)

    h0 = jnp.zeros((B, H), jnp.float32)
    hT, cT = lax.fori_loop(0, T, step, (h0, h0))
    hn_ref[...] = hT
    cn_ref[...] = cT


def lstm_forward(gates_tb4h, mask_tb1, w_hh):
    """gates_tb4h: (T, B, 4H), mask_tb1: (T, B, 1).  Returns y (T,B,H), h_n, c_n (B,H)."""
    T, B, H4 = gates_tb4h.shape
    H = H4 // 4
    return pl.pallas_call(
        _lstm_kernel,
        out_shape=(
            jax.ShapeDtypeStruct((T, B, H), jnp.float32),
            jax.ShapeDtypeStruct((B, H), jnp.float32),
            jax.ShapeDtypeStruct((B, H), jnp.float32),
        ),
        grid=(1,),
        in_specs=[
            pl.BlockSpec((T, B, H4), lambda i: (0, 0, 0)),
            pl.BlockSpec((T, B, 1), lambda i: (0, 0, 0)),
            pl.BlockSpec((H, H4), lambda i: (0, 0)),
        ],
        out_specs=[
            pl.BlockSpec((T, B, H), lambda i: (0, 0, 0)),
            pl.BlockSpec((B, H), lambda i: (0, 0)),
            pl.BlockSpec((B, H), lambda i: (0, 0)),
        ],
        compiler_params=pltpu.CompilerParams(dimension_semantics=("arbitrary",)),
    )(gates_tb4h, mask_tb1, w_hh)


# ----------------------------------------------------------------------------
# Kernel 3: fc3 -> leaky_relu -> fc4 (linear), lane-dense padded output
# ----------------------------------------------------------------------------
def _out_kernel(y_ref, w3_ref, b3_ref, w4_ref, b4_ref, o_ref):
    h = jnp.dot(y_ref[...], w3_ref[...], preferred_element_type=jnp.float32) + b3_ref[...]
    h = jnp.where(h > 0, h, 0.01 * h)
    o_ref[...] = jnp.dot(h, w4_ref[...], preferred_element_type=jnp.float32) + b4_ref[...]


def _out_mlp(y, w3, b3, w4p, b4p, row_tile=512):
    """y: (N, H) -> (N, Pout) with Pout = lane-padded output width (multiple of 128)."""
    N, H = y.shape
    Pout = w4p.shape[1]
    tn = min(row_tile, _round_up(N, 8))
    Npad = _round_up(N, tn)
    if Npad != N:
        y = jnp.pad(y, ((0, Npad - N), (0, 0)))
    out = pl.pallas_call(
        _out_kernel,
        out_shape=jax.ShapeDtypeStruct((Npad, Pout), jnp.float32),
        grid=(Npad // tn,),
        in_specs=[
            pl.BlockSpec((tn, H), lambda i: (i, 0)),
            pl.BlockSpec(w3.shape, lambda i: (0, 0)),
            pl.BlockSpec(b3.shape, lambda i: (0, 0)),
            pl.BlockSpec(w4p.shape, lambda i: (0, 0)),
            pl.BlockSpec(b4p.shape, lambda i: (0, 0)),
        ],
        out_specs=pl.BlockSpec((tn, Pout), lambda i: (i, 0)),
        compiler_params=pltpu.CompilerParams(dimension_semantics=("parallel",)),
    )(y, w3, b3, w4p, b4p)
    return out[:N]


# ----------------------------------------------------------------------------
# Jitted device-side forward (time-major, no transposes, on-device gather)
# ----------------------------------------------------------------------------
@jax.jit
def ddrqn_apply(x_tbd, mask_tb, gather_idx, params):
    T, B, D = x_tbd.shape
    H = params["w_hh"].shape[0]
    out_dim = params["w4"].shape[1]

    # fc1 -> lrelu -> fc2 -> lrelu -> x@W_ih + b  (one pipelined call over all rows)
    gates = _gates_mlp(x_tbd.reshape(T * B, D),
                       params["w1"], params["b1"], params["w2"], params["b2"],
                       params["w_ih"], params["b_rnn"])          # (T*B, 4H)
    gates = gates.reshape(T, B, 4 * H)

    # masked LSTM over time (single kernel invocation)
    y, h_n, c_n = lstm_forward(gates, mask_tb[:, :, None], params["w_hh"])

    # fc3 -> lrelu -> fc4, stored lane-dense (output columns padded to 128)
    Pout = _round_up(out_dim, 128)
    w4p = jnp.pad(params["w4"], ((0, 0), (0, Pout - out_dim)))
    b4p = jnp.pad(params["b4"], ((0, 0), (0, Pout - out_dim)))
    out = _out_mlp(y.reshape(T * B, H), params["w3"], params["b3"], w4p, b4p)
    out = out[:, :out_dim]                                       # (T*B, out_dim)

    # x[mask] in PyTorch (batch-first) order via precomputed flat indices
    out_valid = jnp.take(out, gather_idx, axis=0)
    return out_valid, (h_n[None, :, :], c_n[None, :, :])


# ----------------------------------------------------------------------------
# Host-side list handling (pad_sequence equivalent) + init
# ----------------------------------------------------------------------------
def ddrqn_forward(seqs, params):
    """seqs: list of (len_i, input_dim) float32 arrays (variable length).
    Returns (out[valid positions], (h_n, c_n)) mirroring the PyTorch module with h=None."""
    # TODO(synk): only h=None (zero initial state) is supported, matching the default call.
    B = len(seqs)
    lengths = [int(np.asarray(s).shape[0]) for s in seqs]
    T = max(lengths)
    D = int(np.asarray(seqs[0]).shape[1])

    # Build padded input directly TIME-MAJOR so no device-side transpose is needed.
    x = np.zeros((T, B, D), np.float32)
    mask = np.zeros((T, B), np.float32)
    for b, s in enumerate(seqs):
        L = lengths[b]
        x[:L, b, :] = np.asarray(s, np.float32)
        mask[:L, b] = 1.0
    # Flat indices (into (T*B,) row-major) reproducing PyTorch x[mask] order: b-major, t-minor.
    idx = np.concatenate([np.arange(L, dtype=np.int32) * B + b
                          for b, L in enumerate(lengths)]).astype(np.int32)

    return ddrqn_apply(jnp.asarray(x), jnp.asarray(mask), jnp.asarray(idx), params)


def init_params(key, input_dim, output_dim, mlp_layer_size, rnn_h_size):
    ks = jax.random.split(key, 8)

    def xavier(k, fan_in, fan_out, gain):
        lim = gain * np.sqrt(6.0 / (fan_in + fan_out))
        return jax.random.uniform(k, (fan_in, fan_out), jnp.float32, -lim, lim)

    gain_lrelu = np.sqrt(2.0 / (1.0 + 0.01 ** 2))
    H = rnn_h_size
    lim = 1.0 / np.sqrt(H)
    # PyTorch LSTM: b_ih, b_hh each ~ U(-1/sqrt(H), 1/sqrt(H)); fold their sum.
    b_ih = jax.random.uniform(ks[4], (1, 4 * H), jnp.float32, -lim, lim)
    b_hh = jax.random.uniform(ks[5], (1, 4 * H), jnp.float32, -lim, lim)
    return {
        "w1": xavier(ks[0], input_dim, mlp_layer_size, gain_lrelu),
        "b1": jnp.zeros((1, mlp_layer_size), jnp.float32),
        "w2": xavier(ks[1], mlp_layer_size, H, gain_lrelu),
        "b2": jnp.zeros((1, H), jnp.float32),
        "w_ih": jax.random.uniform(ks[2], (H, 4 * H), jnp.float32, -lim, lim),
        "w_hh": jax.random.uniform(ks[3], (H, 4 * H), jnp.float32, -lim, lim),
        "b_rnn": b_ih + b_hh,
        "w3": xavier(ks[6], H, mlp_layer_size, gain_lrelu),
        "b3": jnp.zeros((1, mlp_layer_size), jnp.float32),
        "w4": xavier(ks[7], mlp_layer_size, output_dim, 1.0),
        "b4": jnp.zeros((1, output_dim), jnp.float32),
    }


if __name__ == "__main__":
    key = jax.random.PRNGKey(0)
    input_dim, output_dim = 8, 4
    mlp_layer_size, rnn_h_size = 32, 128   # H multiple of 128: lane-aligned gate slices

    params = init_params(key, input_dim, output_dim, mlp_layer_size, rnn_h_size)

    # Variable-length sequences (the module's forward takes a list of sequences).
    lengths = [8, 5, 3, 6]
    dkeys = jax.random.split(jax.random.fold_in(key, 7), len(lengths))
    seqs = [jax.random.normal(k, (L, input_dim), jnp.float32)
            for k, L in zip(dkeys, lengths)]

    out, (h_n, c_n) = ddrqn_forward(seqs, params)
    jax.block_until_ready(out)
    jax.block_until_ready(h_n)
    jax.block_until_ready(c_n)

    assert out.shape == (sum(lengths), output_dim)
    assert h_n.shape == (1, len(lengths), rnn_h_size)
    assert c_n.shape == (1, len(lengths), rnn_h_size)
    assert bool(jnp.all(jnp.isfinite(out)))
    print("KERNEL_OK")
</pallas_src>

<mosaic_0001>
module attributes {stable_mosaic.version = 11 : i64} {
  func.func @_gates_kernel(%arg0: i32, %arg1: memref<32x8xf32, #tpu.memory_space<vmem>>, %arg2: memref<8x32xf32, #tpu.memory_space<vmem>>, %arg3: memref<1x32xf32, #tpu.memory_space<vmem>>, %arg4: memref<32x128xf32, #tpu.memory_space<vmem>>, %arg5: memref<1x128xf32, #tpu.memory_space<vmem>>, %arg6: memref<128x512xf32, #tpu.memory_space<vmem>>, %arg7: memref<1x512xf32, #tpu.memory_space<vmem>>, %arg8: memref<32x512xf32, #tpu.memory_space<vmem>>) attributes {dimension_semantics = [#tpu.dimension_semantics<parallel>], iteration_bounds = array<i64: 1>, scalar_prefetch = 0 : i64, scratch_operands = 0 : i64, tpu.core_type = #tpu.core_type<tc>, window_params = [{transform_indices = @transform_0, window_bounds = array<i64: 32, 8>}, {pipeline_mode = #tpu.pipeline_mode<synchronous>, transform_indices = @transform_1, window_bounds = array<i64: 8, 32>}, {pipeline_mode = #tpu.pipeline_mode<synchronous>, transform_indices = @transform_2, window_bounds = array<i64: 1, 32>}, {pipeline_mode = #tpu.pipeline_mode<synchronous>, transform_indices = @transform_3, window_bounds = array<i64: 32, 128>}, {pipeline_mode = #tpu.pipeline_mode<synchronous>, transform_indices = @transform_4, window_bounds = array<i64: 1, 128>}, {pipeline_mode = #tpu.pipeline_mode<synchronous>, transform_indices = @transform_5, window_bounds = array<i64: 128, 512>}, {pipeline_mode = #tpu.pipeline_mode<synchronous>, transform_indices = @transform_6, window_bounds = array<i64: 1, 512>}, {transform_indices = @transform_7, window_bounds = array<i64: 32, 512>}]} {
    %c0 = arith.constant 0 : index
    %c0_0 = arith.constant 0 : index
    %0 = vector.load %arg1[%c0, %c0_0] : memref<32x8xf32, #tpu.memory_space<vmem>>, vector<32x8xf32>
    %c0_1 = arith.constant 0 : index
    %c0_2 = arith.constant 0 : index
    %1 = vector.load %arg2[%c0_1, %c0_2] : memref<8x32xf32, #tpu.memory_space<vmem>>, vector<8x32xf32>
    %cst = arith.constant dense<0.000000e+00> : vector<32x32xf32>
    %2 = tpu.matmul %0, %1, %cst {dimension_numbers = #tpu.dot_dimension_numbers<[1], [0], [0], [1], [0, 0, 1, 1], [], []>} : vector<32x8xf32>, vector<8x32xf32>, vector<32x32xf32> -> vector<32x32xf32>
    %c0_3 = arith.constant 0 : index
    %c0_4 = arith.constant 0 : index
    %3 = vector.load %arg3[%c0_3, %c0_4] : memref<1x32xf32, #tpu.memory_space<vmem>>, vector<1x32xf32>
    %4 = vector.broadcast %3 : vector<1x32xf32> to vector<32x32xf32>
    %5 = arith.addf %2, %4 : vector<32x32xf32>
    %cst_5 = arith.constant 0.000000e+00 : f32
    %6 = vector.broadcast %cst_5 : f32 to vector<32x32xf32>
    %7 = arith.cmpf ogt, %5, %6 : vector<32x32xf32>
    %cst_6 = arith.constant 0.00999999977 : f32
    %8 = vector.broadcast %cst_6 : f32 to vector<32x32xf32>
    %9 = arith.mulf %8, %5 : vector<32x32xf32>
    %10 = arith.select %7, %5, %9 : vector<32x32xi1>, vector<32x32xf32>
    %c0_7 = arith.constant 0 : index
    %c0_8 = arith.constant 0 : index
    %11 = vector.load %arg4[%c0_7, %c0_8] : memref<32x128xf32, #tpu.memory_space<vmem>>, vector<32x128xf32>
    %cst_9 = arith.constant dense<0.000000e+00> : vector<32x128xf32>
    %12 = tpu.matmul %10, %11, %cst_9 {dimension_numbers = #tpu.dot_dimension_numbers<[1], [0], [0], [1], [0, 0, 1, 1], [], []>} : vector<32x32xf32>, vector<32x128xf32>, vector<32x128xf32> -> vector<32x128xf32>
    %c0_10 = arith.constant 0 : index
    %c0_11 = arith.constant 0 : index
    %13 = vector.load %arg5[%c0_10, %c0_11] : memref<1x128xf32, #tpu.memory_space<vmem>>, vector<1x128xf32>
    %14 = vector.broadcast %13 : vector<1x128xf32> to vector<32x128xf32>
    %15 = arith.addf %12, %14 : vector<32x128xf32>
    %cst_12 = arith.constant 0.000000e+00 : f32
    %16 = vector.broadcast %cst_12 : f32 to vector<32x128xf32>
    %17 = arith.cmpf ogt, %15, %16 : vector<32x128xf32>
    %cst_13 = arith.constant 0.00999999977 : f32
    %18 = vector.broadcast %cst_13 : f32 to vector<32x128xf32>
    %19 = arith.mulf %18, %15 : vector<32x128xf32>
    %20 = arith.select %17, %15, %19 : vector<32x128xi1>, vector<32x128xf32>
    %c0_14 = arith.constant 0 : index
    %c0_15 = arith.constant 0 : index
    %21 = vector.load %arg6[%c0_14, %c0_15] : memref<128x512xf32, #tpu.memory_space<vmem>>, vector<128x512xf32>
    %cst_16 = arith.constant dense<0.000000e+00> : vector<32x512xf32>
    %22 = tpu.matmul %20, %21, %cst_16 {dimension_numbers = #tpu.dot_dimension_numbers<[1], [0], [0], [1], [0, 0, 1, 1], [], []>} : vector<32x128xf32>, vector<128x512xf32>, vector<32x512xf32> -> vector<32x512xf32>
    %c0_17 = arith.constant 0 : index
    %c0_18 = arith.constant 0 : index
    %23 = vector.load %arg7[%c0_17, %c0_18] : memref<1x512xf32, #tpu.memory_space<vmem>>, vector<1x512xf32>
    %24 = vector.broadcast %23 : vector<1x512xf32> to vector<32x512xf32>
    %25 = arith.addf %22, %24 : vector<32x512xf32>
    %c0_19 = arith.constant 0 : index
    %c0_20 = arith.constant 0 : index
    %26 = vector.load %arg8[%c0_19, %c0_20] : memref<32x512xf32, #tpu.memory_space<vmem>>, vector<32x512xf32>
    tpu.vector_store %arg8[%c0_19, %c0_20], %25 {strides = array<i32>} : memref<32x512xf32, #tpu.memory_space<vmem>>, vector<32x512xf32>,
    return
  }
  func.func @transform_0(%arg0: i32) -> (i32, i32) {
    %c0_i32 = arith.constant 0 : i32
    %c0_i32_0 = arith.constant 0 : i32
    return %arg0, %c0_i32 : i32, i32
  }
  func.func @transform_1(%arg0: i32) -> (i32, i32) {
    %c0_i32 = arith.constant 0 : i32
    %c0_i32_0 = arith.constant 0 : i32
    %c0_i32_1 = arith.constant 0 : i32
    return %c0_i32, %c0_i32_0 : i32, i32
  }
  func.func @transform_2(%arg0: i32) -> (i32, i32) {
    %c0_i32 = arith.constant 0 : i32
    %c0_i32_0 = arith.constant 0 : i32
    %c0_i32_1 = arith.constant 0 : i32
    return %c0_i32, %c0_i32_0 : i32, i32
  }
  func.func @transform_3(%arg0: i32) -> (i32, i32) {
    %c0_i32 = arith.constant 0 : i32
    %c0_i32_0 = arith.constant 0 : i32
    %c0_i32_1 = arith.constant 0 : i32
    return %c0_i32, %c0_i32_0 : i32, i32
  }
  func.func @transform_4(%arg0: i32) -> (i32, i32) {
    %c0_i32 = arith.constant 0 : i32
    %c0_i32_0 = arith.constant 0 : i32
    %c0_i32_1 = arith.constant 0 : i32
    return %c0_i32, %c0_i32_0 : i32, i32
  }
  func.func @transform_5(%arg0: i32) -> (i32, i32) {
    %c0_i32 = arith.constant 0 : i32
    %c0_i32_0 = arith.constant 0 : i32
    %c0_i32_1 = arith.constant 0 : i32
    return %c0_i32, %c0_i32_0 : i32, i32
  }
  func.func @transform_6(%arg0: i32) -> (i32, i32) {
    %c0_i32 = arith.constant 0 : i32
    %c0_i32_0 = arith.constant 0 : i32
    %c0_i32_1 = arith.constant 0 : i32
    return %c0_i32, %c0_i32_0 : i32, i32
  }
  func.func @transform_7(%arg0: i32) -> (i32, i32) {
    %c0_i32 = arith.constant 0 : i32
    %c0_i32_0 = arith.constant 0 : i32
    return %arg0, %c0_i32 : i32, i32
  }
}

module attributes {stable_mosaic.version = 11 : i64} {
  func.func @_lstm_kernel(%arg0: i32, %arg1: memref<8x4x512xf32, #tpu.memory_space<vmem>>, %arg2: memref<8x4x1xf32, #tpu.memory_space<vmem>>, %arg3: memref<128x512xf32, #tpu.memory_space<vmem>>, %arg4: memref<8x4x128xf32, #tpu.memory_space<vmem>>, %arg5: memref<4x128xf32, #tpu.memory_space<vmem>>, %arg6: memref<4x128xf32, #tpu.memory_space<vmem>>) attributes {dimension_semantics = [#tpu.dimension_semantics<arbitrary>], iteration_bounds = array<i64: 1>, scalar_prefetch = 0 : i64, scratch_operands = 0 : i64, tpu.core_type = #tpu.core_type<tc>, window_params = [{pipeline_mode = #tpu.pipeline_mode<synchronous>, transform_indices = @transform_0, window_bounds = array<i64: 8, 4, 512>}, {pipeline_mode = #tpu.pipeline_mode<synchronous>, transform_indices = @transform_1, window_bounds = array<i64: 8, 4, 1>}, {pipeline_mode = #tpu.pipeline_mode<synchronous>, transform_indices = @transform_2, window_bounds = array<i64: 128, 512>}, {pipeline_mode = #tpu.pipeline_mode<synchronous>, transform_indices = @transform_3, window_bounds = array<i64: 8, 4, 128>}, {pipeline_mode = #tpu.pipeline_mode<synchronous>, transform_indices = @transform_4, window_bounds = array<i64: 4, 128>}, {pipeline_mode = #tpu.pipeline_mode<synchronous>, transform_indices = @transform_5, window_bounds = array<i64: 4, 128>}]} {
    %cst = arith.constant 0.000000e+00 : f32
    %0 = vector.broadcast %cst : f32 to vector<4x128xf32>
    %c0_i32 = arith.constant 0 : i32
    %c8_i32 = arith.constant 8 : i32
    %1 = arith.addi %c0_i32, %c8_i32 : i32
    %c1_i32 = arith.constant 1 : i32
    %2:2 = scf.for %arg7 = %c0_i32 to %1 step %c1_i32 iter_args(%arg8 = %0, %arg9 = %0) -> (vector<4x128xf32>, vector<4x128xf32>)  : i32 {
      %5 = arith.index_cast %arg7 : i32 to index
      %c0_4 = arith.constant 0 : index
      %c0_5 = arith.constant 0 : index
      %6 = vector.load %arg1[%5, %c0_4, %c0_5] : memref<8x4x512xf32, #tpu.memory_space<vmem>>, vector<1x4x512xf32>
      %7 = vector.shape_cast %6 : vector<1x4x512xf32> to vector<4x512xf32>
      %c0_6 = arith.constant 0 : index
      %c0_7 = arith.constant 0 : index
      %8 = vector.load %arg3[%c0_6, %c0_7] : memref<128x512xf32, #tpu.memory_space<vmem>>, vector<128x512xf32>
      %cst_8 = arith.constant dense<0.000000e+00> : vector<4x512xf32>
      %9 = tpu.matmul %arg8, %8, %cst_8 {dimension_numbers = #tpu.dot_dimension_numbers<[1], [0], [0], [1], [0, 0, 1, 1], [], []>} : vector<4x128xf32>, vector<128x512xf32>, vector<4x512xf32> -> vector<4x512xf32>
      %10 = arith.addf %7, %9 : vector<4x512xf32>
      %11 = vector.extract_strided_slice %10 {offsets = [0, 0], sizes = [4, 128], strides = [1, 1]} : vector<4x512xf32> to vector<4x128xf32>
      %12 = arith.negf %11 : vector<4x128xf32>
      %13 = math.exp %12 : vector<4x128xf32>
      %cst_9 = arith.constant 1.000000e+00 : f32
      %14 = vector.broadcast %cst_9 : f32 to vector<4x128xf32>
      %15 = arith.addf %14, %13 : vector<4x128xf32>
      %16 = arith.divf %14, %15 : vector<4x128xf32>
      %17 = vector.extract_strided_slice %10 {offsets = [0, 128], sizes = [4, 128], strides = [1, 1]} : vector<4x512xf32> to vector<4x128xf32>
      %18 = arith.negf %17 : vector<4x128xf32>
      %19 = math.exp %18 : vector<4x128xf32>
      %cst_10 = arith.constant 1.000000e+00 : f32
      %20 = vector.broadcast %cst_10 : f32 to vector<4x128xf32>
      %21 = arith.addf %20, %19 : vector<4x128xf32>
      %22 = arith.divf %20, %21 : vector<4x128xf32>
      %23 = vector.extract_strided_slice %10 {offsets = [0, 256], sizes = [4, 128], strides = [1, 1]} : vector<4x512xf32> to vector<4x128xf32>
      %24 = math.tanh %23 : vector<4x128xf32>
      %25 = vector.extract_strided_slice %10 {offsets = [0, 384], sizes = [4, 128], strides = [1, 1]} : vector<4x512xf32> to vector<4x128xf32>
      %26 = arith.negf %25 : vector<4x128xf32>
      %27 = math.exp %26 : vector<4x128xf32>
      %cst_11 = arith.constant 1.000000e+00 : f32
      %28 = vector.broadcast %cst_11 : f32 to vector<4x128xf32>
      %29 = arith.addf %28, %27 : vector<4x128xf32>
      %30 = arith.divf %28, %29 : vector<4x128xf32>
      %31 = arith.mulf %22, %arg9 : vector<4x128xf32>
      %32 = arith.mulf %16, %24 : vector<4x128xf32>
      %33 = arith.addf %31, %32 : vector<4x128xf32>
      %34 = math.tanh %33 : vector<4x128xf32>
      %35 = arith.mulf %30, %34 : vector<4x128xf32>
      %36 = arith.index_cast %arg7 : i32 to index
      %c0_12 = arith.constant 0 : index
      %c0_13 = arith.constant 0 : index
      %37 = vector.load %arg2[%36, %c0_12, %c0_13] : memref<8x4x1xf32, #tpu.memory_space<vmem>>, vector<1x4x1xf32>
      %38 = vector.shape_cast %37 : vector<1x4x1xf32> to vector<4x1xf32>
      %cst_14 = arith.constant 0.000000e+00 : f32
      %39 = vector.broadcast %cst_14 : f32 to vector<4x1xf32>
      %40 = arith.cmpf ogt, %38, %39 : vector<4x1xf32>
      %41 = vector.shape_cast %40 : vector<4x1xi1> to vector<4x1xi1>
      %42 = vector.broadcast %41 : vector<4x1xi1> to vector<4x128xi1>
      %43 = arith.select %42, %35, %arg8 : vector<4x128xi1>, vector<4x128xf32>
      %44 = vector.shape_cast %40 : vector<4x1xi1> to vector<4x1xi1>
      %45 = vector.broadcast %44 : vector<4x1xi1> to vector<4x128xi1>
      %46 = arith.select %45, %33, %arg9 : vector<4x128xi1>, vector<4x128xf32>
      %cst_15 = arith.constant 0.000000e+00 : f32
      %47 = vector.shape_cast %40 : vector<4x1xi1> to vector<4x1xi1>
      %48 = vector.broadcast %47 : vector<4x1xi1> to vector<4x128xi1>
      %49 = vector.broadcast %cst_15 : f32 to vector<4x128xf32>
      %50 = arith.select %48, %35, %49 : vector<4x128xi1>, vector<4x128xf32>
      %51 = arith.index_cast %arg7 : i32 to index
      %c0_16 = arith.constant 0 : index
      %c0_17 = arith.constant 0 : index
      %52 = vector.load %arg4[%51, %c0_16, %c0_17] : memref<8x4x128xf32, #tpu.memory_space<vmem>>, vector<1x4x128xf32>
      %53 = vector.shape_cast %52 : vector<1x4x128xf32> to vector<4x128xf32>
      %54 = vector.shape_cast %50 : vector<4x128xf32> to vector<1x4x128xf32>
      tpu.vector_store %arg4[%51, %c0_16, %c0_17], %54 {strides = array<i32>} : memref<8x4x128xf32, #tpu.memory_space<vmem>>, vector<1x4x128xf32>,
      scf.yield %43, %46 : vector<4x128xf32>, vector<4x128xf32>
    }
    %c8_i32_0 = arith.constant 8 : i32
    %c0 = arith.constant 0 : index
    %c0_1 = arith.constant 0 : index
    %3 = vector.load %arg5[%c0, %c0_1] : memref<4x128xf32, #tpu.memory_space<vmem>>, vector<4x128xf32>
    tpu.vector_store %arg5[%c0, %c0_1], %2#0 {strides = array<i32>} : memref<4x128xf32, #tpu.memory_space<vmem>>, vector<4x128xf32>,
    %c0_2 = arith.constant 0 : index
    %c0_3 = arith.constant 0 : index
    %4 = vector.load %arg6[%c0_2, %c0_3] : memref<4x128xf32, #tpu.memory_space<vmem>>, vector<4x128xf32>
    tpu.vector_store %arg6[%c0_2, %c0_3], %2#1 {strides = array<i32>} : memref<4x128xf32, #tpu.memory_space<vmem>>, vector<4x128xf32>,
    return
  }
  func.func @transform_0(%arg0: i32) -> (i32, i32, i32) {
    %c0_i32 = arith.constant 0 : i32
    %c0_i32_0 = arith.constant 0 : i32
    %c0_i32_1 = arith.constant 0 : i32
    %c0_i32_2 = arith.constant 0 : i32
    return %c0_i32, %c0_i32_0, %c0_i32_1 : i32, i32, i32
  }
  func.func @transform_1(%arg0: i32) -> (i32, i32, i32) {
    %c0_i32 = arith.constant 0 : i32
    %c0_i32_0 = arith.constant 0 : i32
    %c0_i32_1 = arith.constant 0 : i32
    %c0_i32_2 = arith.constant 0 : i32
    return %c0_i32, %c0_i32_0, %c0_i32_1 : i32, i32, i32
  }
  func.func @transform_2(%arg0: i32) -> (i32, i32) {
    %c0_i32 = arith.constant 0 : i32
    %c0_i32_0 = arith.constant 0 : i32
    %c0_i32_1 = arith.constant 0 : i32
    return %c0_i32, %c0_i32_0 : i32, i32
  }
  func.func @transform_3(%arg0: i32) -> (i32, i32, i32) {
    %c0_i32 = arith.constant 0 : i32
    %c0_i32_0 = arith.constant 0 : i32
    %c0_i32_1 = arith.constant 0 : i32
    %c0_i32_2 = arith.constant 0 : i32
    return %c0_i32, %c0_i32_0, %c0_i32_1 : i32, i32, i32
  }
  func.func @transform_4(%arg0: i32) -> (i32, i32) {
    %c0_i32 = arith.constant 0 : i32
    %c0_i32_0 = arith.constant 0 : i32
    %c0_i32_1 = arith.constant 0 : i32
    return %c0_i32, %c0_i32_0 : i32, i32
  }
  func.func @transform_5(%arg0: i32) -> (i32, i32) {
    %c0_i32 = arith.constant 0 : i32
    %c0_i32_0 = arith.constant 0 : i32
    %c0_i32_1 = arith.constant 0 : i32
    return %c0_i32, %c0_i32_0 : i32, i32
  }
}

module attributes {stable_mosaic.version = 11 : i64} {
  func.func @_out_kernel(%arg0: i32, %arg1: memref<32x128xf32, #tpu.memory_space<vmem>>, %arg2: memref<128x32xf32, #tpu.memory_space<vmem>>, %arg3: memref<1x32xf32, #tpu.memory_space<vmem>>, %arg4: memref<32x128xf32, #tpu.memory_space<vmem>>, %arg5: memref<1x128xf32, #tpu.memory_space<vmem>>, %arg6: memref<32x128xf32, #tpu.memory_space<vmem>>) attributes {dimension_semantics = [#tpu.dimension_semantics<parallel>], iteration_bounds = array<i64: 1>, scalar_prefetch = 0 : i64, scratch_operands = 0 : i64, tpu.core_type = #tpu.core_type<tc>, window_params = [{transform_indices = @transform_0, window_bounds = array<i64: 32, 128>}, {pipeline_mode = #tpu.pipeline_mode<synchronous>, transform_indices = @transform_1, window_bounds = array<i64: 128, 32>}, {pipeline_mode = #tpu.pipeline_mode<synchronous>, transform_indices = @transform_2, window_bounds = array<i64: 1, 32>}, {pipeline_mode = #tpu.pipeline_mode<synchronous>, transform_indices = @transform_3, window_bounds = array<i64: 32, 128>}, {pipeline_mode = #tpu.pipeline_mode<synchronous>, transform_indices = @transform_4, window_bounds = array<i64: 1, 128>}, {transform_indices = @transform_5, window_bounds = array<i64: 32, 128>}]} {
    %c0 = arith.constant 0 : index
    %c0_0 = arith.constant 0 : index
    %0 = vector.load %arg1[%c0, %c0_0] : memref<32x128xf32, #tpu.memory_space<vmem>>, vector<32x128xf32>
    %c0_1 = arith.constant 0 : index
    %c0_2 = arith.constant 0 : index
    %1 = vector.load %arg2[%c0_1, %c0_2] : memref<128x32xf32, #tpu.memory_space<vmem>>, vector<128x32xf32>
    %cst = arith.constant dense<0.000000e+00> : vector<32x32xf32>
    %2 = tpu.matmul %0, %1, %cst {dimension_numbers = #tpu.dot_dimension_numbers<[1], [0], [0], [1], [0, 0, 1, 1], [], []>} : vector<32x128xf32>, vector<128x32xf32>, vector<32x32xf32> -> vector<32x32xf32>
    %c0_3 = arith.constant 0 : index
    %c0_4 = arith.constant 0 : index
    %3 = vector.load %arg3[%c0_3, %c0_4] : memref<1x32xf32, #tpu.memory_space<vmem>>, vector<1x32xf32>
    %4 = vector.broadcast %3 : vector<1x32xf32> to vector<32x32xf32>
    %5 = arith.addf %2, %4 : vector<32x32xf32>
    %cst_5 = arith.constant 0.000000e+00 : f32
    %6 = vector.broadcast %cst_5 : f32 to vector<32x32xf32>
    %7 = arith.cmpf ogt, %5, %6 : vector<32x32xf32>
    %cst_6 = arith.constant 0.00999999977 : f32
    %8 = vector.broadcast %cst_6 : f32 to vector<32x32xf32>
    %9 = arith.mulf %8, %5 : vector<32x32xf32>
    %10 = arith.select %7, %5, %9 : vector<32x32xi1>, vector<32x32xf32>
    %c0_7 = arith.constant 0 : index
    %c0_8 = arith.constant 0 : index
    %11 = vector.load %arg4[%c0_7, %c0_8] : memref<32x128xf32, #tpu.memory_space<vmem>>, vector<32x128xf32>
    %cst_9 = arith.constant dense<0.000000e+00> : vector<32x128xf32>
    %12 = tpu.matmul %10, %11, %cst_9 {dimension_numbers = #tpu.dot_dimension_numbers<[1], [0], [0], [1], [0, 0, 1, 1], [], []>} : vector<32x32xf32>, vector<32x128xf32>, vector<32x128xf32> -> vector<32x128xf32>
    %c0_10 = arith.constant 0 : index
    %c0_11 = arith.constant 0 : index
    %13 = vector.load %arg5[%c0_10, %c0_11] : memref<1x128xf32, #tpu.memory_space<vmem>>, vector<1x128xf32>
    %14 = vector.broadcast %13 : vector<1x128xf32> to vector<32x128xf32>
    %15 = arith.addf %12, %14 : vector<32x128xf32>
    %c0_12 = arith.constant 0 : index
    %c0_13 = arith.constant 0 : index
    %16 = vector.load %arg6[%c0_12, %c0_13] : memref<32x128xf32, #tpu.memory_space<vmem>>, vector<32x128xf32>
    tpu.vector_store %arg6[%c0_12, %c0_13], %15 {strides = array<i32>} : memref<32x128xf32, #tpu.memory_space<vmem>>, vector<32x128xf32>,
    return
  }
  func.func @transform_0(%arg0: i32) -> (i32, i32) {
    %c0_i32 = arith.constant 0 : i32
    %c0_i32_0 = arith.constant 0 : i32
    return %arg0, %c0_i32 : i32, i32
  }
  func.func @transform_1(%arg0: i32) -> (i32, i32) {
    %c0_i32 = arith.constant 0 : i32
    %c0_i32_0 = arith.constant 0 : i32
    %c0_i32_1 = arith.constant 0 : i32
    return %c0_i32, %c0_i32_0 : i32, i32
  }
  func.func @transform_2(%arg0: i32) -> (i32, i32) {
    %c0_i32 = arith.constant 0 : i32
    %c0_i32_0 = arith.constant 0 : i32
    %c0_i32_1 = arith.constant 0 : i32
    return %c0_i32, %c0_i32_0 : i32, i32
  }
  func.func @transform_3(%arg0: i32) -> (i32, i32) {
    %c0_i32 = arith.constant 0 : i32
    %c0_i32_0 = arith.constant 0 : i32
    %c0_i32_1 = arith.constant 0 : i32
    return %c0_i32, %c0_i32_0 : i32, i32
  }
  func.func @transform_4(%arg0: i32) -> (i32, i32) {
    %c0_i32 = arith.constant 0 : i32
    %c0_i32_0 = arith.constant 0 : i32
    %c0_i32_1 = arith.constant 0 : i32
    return %c0_i32, %c0_i32_0 : i32, i32
  }
  func.func @transform_5(%arg0: i32) -> (i32, i32) {
    %c0_i32 = arith.constant 0 : i32
    %c0_i32_0 = arith.constant 0 : i32
    return %arg0, %c0_i32 : i32, i32
  }
}

</mosaic_0001>

<bundles_post_ra>
// kernel: ddrqn_apply.4
= control target key start
LH: loop header
LB: loop body
LE: loop exit
PB: predicated region body
PF: predicated region fallthrough
CT: control target
= control target key end

     0   :  { %11 = vsyncpa [#allocation3], 0  ;;  %s823_s0 = inlined_call_operand.vmem [shape: f32[8,4,512], index: 0, kind: input, shape index: {}]   ;;  %s824_s1 = inlined_call_operand.vmem [shape: f32[8,4,1], index: 1, kind: input, shape index: {}]   ;;  %s825_s2 = inlined_call_operand.vmem [shape: f32[128,512], index: 2, kind: input, shape index: {}]   ;;  %s826_s3 = inlined_call_operand.vmem [shape: f32[8,4,128], index: 3, kind: output, shape index: {0}]   ;;  %s827_s4 = inlined_call_operand.hbm [shape: f32[4,128], index: 4, kind: output, shape index: {1}]   ;;  %s828_s5 = inlined_call_operand.hbm [shape: f32[4,128], index: 5, kind: output, shape index: {2}]  }
   0x1   :  { %12 = vsyncpa [#allocation5], 0  ;;  %v563_v0 = vmov 0.0   ;;  %v565_v1 = vmov 0.0   ;;  %s567_s18 = smov 0  }
   0x2 LB: > { %v33_v2 = vld [vmem:[%s825_s2 + $0x8] sm:$0xff]  ;;  %v32_v4 = vld [vmem:[%s825_s2] sm:$0xff]  ;;  %v529_v9 = vmov 0.0   ;;  %v530_v15 = vmov 0   ;;  %v35_v22 = vld [vmem:[%s825_s2 + $0x18] sm:$0xff]  ;;  %s342_s23 = sshll.u32 %s527_s18, 2  ;;  %s527_s18 = sphi %s567_s18, %s24_s18   ;;  %v523_v1 = vphi %v565_v1, %v830_v1   ;;  %v519_v0 = vphi %v563_v0, %v829_v0  }
   0x3   : > { %v37_v3 = vld [vmem:[%s825_s2 + $0x28] sm:$0xff]  ;;  %v36_v6 = vld [vmem:[%s825_s2 + $0x20] sm:$0xff]  ;;  %160 = vmatprep.mubr.f32.mxu0 %v529_v9  ;;  %231 = vmatprep.mubr.f32.mxu1 %v529_v9  ;;  %v39_v23 = vld [vmem:[%s825_s2 + $0x38] sm:$0xff]  ;;  %s278_s17 = scalar_lea.vmem %s824_s1, %s342_s23  ;;  %s347_s8 = sshll.u32 %s527_s18, 4 }
   0x4   : > { %v348_v5 = vpack.c.bf16 %v37_v3, %v33_v2  ;;  %v41_v7 = vld [vmem:[%s825_s2 + $0x48] sm:$0xff]  ;;  %v350_v10 = vpack.c.bf16 %v36_v6, %v32_v4  ;;  %v40_v12 = vld [vmem:[%s825_s2 + $0x40] sm:$0xff]  ;;  %440 = vset.pattern.permute.xlu0 %v530_v15  ;;  %v380_v25 = vpack.c.bf16 %v39_v23, %v35_v22  ;;  %v34_v26 = vld [vmem:[%s825_s2 + $0x10] sm:$0xff]  ;;  %s29_s11 = scalar_lea.vmem %s823_s0, %s347_s8  ;;  %s289_s14 = scalar_lea.vmem %s826_s3, %s342_s23 }
   0x5   : > { %v45_v8 = vld [vmem:[%s825_s2 + $0x68] sm:$0xff]  ;;  %v44_v13 = vld [vmem:[%s825_s2 + $0x60] sm:$0xff]  ;;  %v38_v27 = vld [vmem:[%s825_s2 + $0x30] sm:$0xff]  ;;  %s24_s18 = sadd.s32 1, %s527_s18  }
   0x6   : > { %v352_v11 = vpack.c.bf16 %v45_v8, %v41_v7  ;;  %v49_v14 = vld [vmem:[%s825_s2 + $0x88] sm:$0xff]  ;;  %349 = vmatprep.subr.bf16.mxu0 %v348_v5  ;;  %v354_v17 = vpack.c.bf16 %v44_v13, %v40_v12  ;;  %v48_v18 = vld [vmem:[%s825_s2 + $0x80] sm:$0xff]  ;;  %v382_v28 = vpack.c.bf16 %v38_v27, %v34_v26  ;;  %381 = vmatprep.subr.bf16.mxu1 %v380_v25  ;;  %v43_v30 = vld [vmem:[%s825_s2 + $0x58] sm:$0xff]  ;;  %p21_p0 = scmp.ge.s32.totalorder %s24_s18, 8  }
   0x7   : > { %v53_v16 = vld [vmem:[%s825_s2 + $0xa8] sm:$0xff]  ;;  %351 = vmatpush1.bf16.msra.mxu0 %v350_v10  ;;  %v52_v19 = vld [vmem:[%s825_s2 + $0xa0] sm:$0xff]  ;;  %v47_v31 = vld [vmem:[%s825_s2 + $0x78] sm:$0xff]  ;;  %s531_s15 = smov (%p21_p0), [#allocation2]   ;;  %s532_s23 = smov (%p21_p0), [#allocation4]  }
   0x8   : > { %353 = vmatprep.subr.bf16.mxu0 %v352_v11  ;;  %v356_v20 = vpack.c.bf16 %v53_v16, %v49_v14  ;;  %v57_v21 = vld [vmem:[%s825_s2 + $0xc8] sm:$0xff]  ;;  %v358_v29 = vpack.c.bf16 %v52_v19, %v48_v18  ;;  %v42_v32 = vld [vmem:[%s825_s2 + $0x50] sm:$0xff]  ;;  %v56_v34 = vld [vmem:[%s825_s2 + $0xc0] sm:$0xff]  ;;  %383 = vmatpush1.bf16.msra.mxu1 %v382_v28  ;;  %v384_v36 = vpack.c.bf16 %v47_v31, %v43_v30  ;;  %s301_s16 = sshll.u32 (%p21_p0), %s531_s15, 4  ;;  %s302_s16 = int_to_ptr.vmem [resolvable:$true] %s301_s16 }
   0x9   : > { %v61_v24 = vld [vmem:[%s825_s2 + $0xe8] sm:$0xff]  ;;  %v60_v35 = vld [vmem:[%s825_s2 + $0xe0] sm:$0xff]  ;;  %v46_v37 = vld [vmem:[%s825_s2 + $0x70] sm:$0xff]  ;;  %s457_s19 = scalar_lea.vmem (%p21_p0), %s302_s16, 64  ;;  %p462_p2 = scmp.lt.s32.totalorder (%p21_p0), %s302_s16, %s302_s16 }
   0xa   : > { %v360_v33 = vpack.c.bf16 %v61_v24, %v57_v21  ;;  %v65_v38 = vld [vmem:[%s825_s2 + $0x108] sm:$0xff]  ;;  %v386_v40 = vpack.c.bf16 %v46_v37, %v42_v32  ;;  %v51_v41 = vld [vmem:[%s825_s2 + $0x98] sm:$0xff]  ;;  %385 = vmatprep.subr.bf16.mxu1 %v384_v36  ;;  %v50_v43 = vld [vmem:[%s825_s2 + $0x90] sm:$0xff]  ;;  %v362_v45 = vpack.c.bf16 %v60_v35, %v56_v34  ;;  %p458_p1 = scmp.ne.s32.totalorder (%p21_p0), %s302_s16, %s457_s19  ;;  %p463_p3 = scmp.lt.s32.totalorder (%p21_p0), %s457_s19, %s457_s19 }
   0xb   : > { %355 = vmatpush1.bf16.msra.mxu0 %v354_v17  ;;  %v69_v39 = vld [vmem:[%s825_s2 + $0x128] sm:$0xff]  ;;  %v55_v42 = vld [vmem:[%s825_s2 + $0xb8] sm:$0xff]  ;;  %v54_v44 = vld [vmem:[%s825_s2 + $0xb0] sm:$0xff] }
   0xc   : > { %357 = vmatprep.subr.bf16.mxu0 %v356_v20  ;;  %v64_v46 = vld [vmem:[%s825_s2 + $0x100] sm:$0xff]  ;;  %v388_v48 = vpack.c.bf16 %v55_v42, %v51_v41  ;;  %v364_v49 = vpack.c.bf16 %v69_v39, %v65_v38  ;;  %387 = vmatpush1.bf16.msra.mxu1 %v386_v40  ;;  %v73_v50 = vld [vmem:[%s825_s2 + $0x148] sm:$0xff]  ;;  %v390_v51 = vpack.c.bf16 %v54_v44, %v50_v43  ;;  %v59_v52 = vld [vmem:[%s825_s2 + $0xd8] sm:$0xff]  ;;  %p464_p4 = por (%p21_p0), %p463_p3, %p462_p2 }
   0xd   : > { %v68_v47 = vld [vmem:[%s825_s2 + $0x120] sm:$0xff]  ;;  %v63_v53 = vld [vmem:[%s825_s2 + $0xf8] sm:$0xff]  ;;  %v77_v54 = vld [vmem:[%s825_s2 + $0x168] sm:$0xff] }
   0xe   : > { %389 = vmatprep.subr.bf16.mxu1 %v388_v48  ;;  %v392_v55 = vpack.c.bf16 %v63_v53, %v59_v52  ;;  %v58_v56 = vld [vmem:[%s825_s2 + $0xd0] sm:$0xff]  ;;  %v366_v58 = vpack.c.bf16 %v68_v47, %v64_v46  ;;  %v67_v59 = vld [vmem:[%s825_s2 + $0x118] sm:$0xff]  ;;  %v368_v61 = vpack.c.bf16 %v77_v54, %v73_v50  ;;  %v72_v62 = vld [vmem:[%s825_s2 + $0x140] sm:$0xff]  ;;  %p465_p5 = pnand (%p21_p0), %p464_p4, %p458_p1 }
   0xf   : > { %359 = vmatpush1.bf16.msra.mxu0 %v358_v29  ;;  %v62_v57 = vld [vmem:[%s825_s2 + $0xf0] sm:$0xff]  ;;  %v71_v60 = vld [vmem:[%s825_s2 + $0x138] sm:$0xff]  ;;  %v76_v63 = vld [vmem:[%s825_s2 + $0x160] sm:$0xff] }
  0x10   : > { %361 = vmatprep.subr.bf16.mxu0 %v360_v33  ;;  %391 = vmatpush1.bf16.msra.mxu1 %v390_v51  ;;  %v81_v2 = vld [vmem:[%s825_s2 + $0x188] sm:$0xff]  ;;  %v394_v3 = vpack.c.bf16 %v62_v57, %v58_v56  ;;  %v396_v5 = vpack.c.bf16 %v71_v60, %v67_v59  ;;  %v66_v6 = vld [vmem:[%s825_s2 + $0x110] sm:$0xff]  ;;  %v75_v8 = vld [vmem:[%s825_s2 + $0x158] sm:$0xff]  ;;  %v370_v10 = vpack.c.bf16 %v76_v63, %v72_v62 }
  0x11   : > { %v85_v4 = vld [vmem:[%s825_s2 + $0x1a8] sm:$0xff]  ;;  %393 = vmatprep.subr.bf16.mxu1 %v392_v55  ;;  %v70_v7 = vld [vmem:[%s825_s2 + $0x130] sm:$0xff]  ;;  %v79_v9 = vld [vmem:[%s825_s2 + $0x178] sm:$0xff] }
  0x12   : > { %v80_v11 = vld [vmem:[%s825_s2 + $0x180] sm:$0xff]  ;;  %v372_v12 = vpack.c.bf16 %v85_v4, %v81_v2  ;;  %v89_v14 = vld [vmem:[%s825_s2 + $0x1c8] sm:$0xff]  ;;  %v398_v16 = vpack.c.bf16 %v70_v7, %v66_v6  ;;  %v400_v19 = vpack.c.bf16 %v79_v9, %v75_v8  ;;  %v74_v20 = vld [vmem:[%s825_s2 + $0x150] sm:$0xff] }
  0x13   : > { %363 = vmatpush1.bf16.msra.mxu0 %v362_v45  ;;  %v84_v13 = vld [vmem:[%s825_s2 + $0x1a0] sm:$0xff]  ;;  %v93_v18 = vld [vmem:[%s825_s2 + $0x1e8] sm:$0xff]  ;;  %v78_v21 = vld [vmem:[%s825_s2 + $0x170] sm:$0xff] }
  0x14   : > { %365 = vmatprep.subr.bf16.mxu0 %v364_v49  ;;  %395 = vmatpush1.bf16.msra.mxu1 %v394_v3  ;;  %v279_v17 = vld [vmem:[%s278_s17] sm:$0xf]  ;;  %v83_v22 = vld [vmem:[%s825_s2 + $0x198] sm:$0xff]  ;;  %v374_v25 = vpack.c.bf16 %v84_v13, %v80_v11  ;;  %v376_v26 = vpack.c.bf16 %v93_v18, %v89_v14  ;;  %v402_v29 = vpack.c.bf16 %v78_v21, %v74_v20  ;;  %v86_v31 = vld [vmem:[%s825_s2 + $0x1b0] sm:$0xff]  ;;  %s311_s17 = sshll.u32 (%p21_p0), %s532_s23, 4  ;;  %s312_s17 = int_to_ptr.vmem [resolvable:$true] %s311_s17 }
  0x15   : > { %397 = vmatprep.subr.bf16.mxu1 %v396_v5  ;;  %vm280_vm0 = vcmp.gt.f32.partialorder %v279_v17, 0.0  ;;  %v87_v23 = vld [vmem:[%s825_s2 + $0x1b8] sm:$0xff]  ;;  %v88_v27 = vld [vmem:[%s825_s2 + $0x1c0] sm:$0xff]  ;;  %v90_v37 = vld [vmem:[%s825_s2 + $0x1d0] sm:$0xff] }
  0x16   : > { %v281_v24 = vsel %vm280_vm0, 1, %v530_v15  ;;  %v92_v28 = vld [vmem:[%s825_s2 + $0x1e0] sm:$0xff]  ;;  %v404_v30 = vpack.c.bf16 %v87_v23, %v83_v22  ;;  %v82_v15 = vld [vmem:[%s825_s2 + $0x190] sm:$0xff]  ;;  %v91_v32 = vld [vmem:[%s825_s2 + $0x1d8] sm:$0xff] }
  0x17   : > { %367 = vmatpush1.bf16.msra.mxu0 %v366_v58  ;;  %283 = vperm.xlu0 %440, %v281_v24   ;;  %v95_v33 = vld [vmem:[%s825_s2 + $0x1f8] sm:$0xff]  ;;  %v378_v34 = vpack.c.bf16 %v92_v28, %v88_v27  ;;  %v406_v35 = vpack.c.bf16 %v86_v31, %v82_v15  ;;  %v94_v38 = vld [vmem:[%s825_s2 + $0x1f0] sm:$0xff]  ;;  %v30_v41 = vld [vmem:[%s29_s11] sm:$0xff] }
  0x18   : > { %369 = vmatprep.subr.bf16.mxu0 %v368_v61  ;;  %399 = vmatpush1.bf16.msra.mxu1 %v398_v16  ;;  %v408_v36 = vpack.c.bf16 %v95_v33, %v91_v32  ;;  %v410_v39 = vpack.c.bf16 %v94_v38, %v90_v37  ;;  %v31_v48 = vld [vmem:[%s29_s11 + $0x8] sm:$0xff] }
  0x19   : > { %401 = vmatprep.subr.bf16.mxu1 %v400_v19 }
  0x1b   : > { %371 = vmatpush1.bf16.msra.mxu0 %v370_v10 }
  0x1c   : > { %373 = vmatprep.subr.bf16.mxu0 %v372_v12  ;;  %403 = vmatpush1.bf16.msra.mxu1 %v402_v29 }
  0x1d   : > { %405 = vmatprep.subr.bf16.mxu1 %v404_v30 }
  0x1f   : > { %375 = vmatpush1.bf16.msra.mxu0 %v374_v25 }
  0x20   : > { %377 = vmatprep.subr.bf16.mxu0 %v376_v26  ;;  %407 = vmatpush1.bf16.msra.mxu1 %v406_v35 }
  0x21   : > { %409 = vmatprep.subr.bf16.mxu1 %v408_v36 }
  0x23   : > { %379 = vmatpush1.bf16.msra.mxu0 %v378_v34 }
  0x24   : > { %411 = vmatpush1.bf16.msra.mxu1 %v410_v39 }
  0x26   : > { %161 = vmatmul.mubr.f32.vlgmr.msra.gmra.mrb[0].mxu0 %v523_v1 }
  0x27   : > { %232 = vmatmul.mubr.f32.vlgmr.msra.gmra.mrb[0].mxu1 %v523_v1 }
  0x96   : > { %v284_v63 = vpop.permute.xlu0 %283 }
  0x97   : > { %vm285_vm1 = vcmp.eq.s32.totalorder %v284_v63, 1 }
  0xf9   : > { %v162_v40 = vpop.f32.mrb[0].mxu0 }
  0xfa   : > { %v164_v42 = vpop.f32.mrb[1].mxu0  ;;  %v233_v45 = vpop.f32.mrb[0].mxu1 }
  0xfb   : > { %v242_v43 = vcombine.low %v162_v40, %v164_v42  ;;  %v235_v49 = vpop.f32.mrb[1].mxu1 }
  0xfc   : > { %v243_v50 = vcombine.low %v233_v45, %v235_v49 }
  0xfd   : > { %v246_v44 = vadd.f32 %v242_v43, %v30_v41 }
  0xfe   : > { %v247_v52 = vadd.f32 %v243_v50, %v31_v48 }
  0xff   : > { %v344_v46 = vmul.f32 -1.442695, %v246_v44  ;;  %v255_v47 = vrot.slane %v246_v44, 4 }
 0x100   : > { %v265_v53 = vrot.slane %v247_v52, 4 }
 0x101   : > { %441 = vpow2.f32 %v344_v46  ;;  %v345_v51 = vmul.f32 -1.442695, %v255_v47 }
 0x102   : > { %v346_v54 = vmul.f32 -1.442695, %v265_v53 }
 0x103   : > { %443 = vpow2.f32 %v345_v51 }
 0x104   : > { %445 = vtanh.f32 %v247_v52 }
 0x105   : > { %447 = vpow2.f32 %v346_v54 }
 0x10b   : > { %v442_v55 = vpop.eup %441 }
 0x10c   : > { %v251_v56 = vadd.f32 1.0, %v442_v55 }
 0x10d   : > { %v444_v57 = vpop.eup %443 }
 0x10e   : > { %449 = vrcp.f32 %v251_v56  ;;  %v260_v58 = vadd.f32 1.0, %v444_v57  ;;  %v446_v59 = vpop.eup %445 }
 0x10f   : > { %v448_v60 = vpop.eup %447 }
 0x110   : > { %451 = vrcp.f32 %v260_v58  ;;  %v270_v62 = vadd.f32 1.0, %v448_v60 }
 0x112   : > { %453 = vrcp.f32 %v270_v62 }
 0x118   : > { %v450_v61 = vpop.eup %449 }
 0x119   : > { %v274_v2 = vmul.f32 %v450_v61, %v446_v59 }
 0x11a   : > { %v452_v3 = vpop.eup %451 }
 0x11b   : > { %v273_v4 = vmul.f32 %v519_v0, %v452_v3 }
 0x11c   : > { %v454_v7 = vpop.eup %453 }
 0x11d   : > { %v275_v5 = vadd.f32 %v274_v2, %v273_v4 }
 0x11f   : > { %455 = vtanh.f32 %v275_v5  ;;  %v287_v6 = vsel %vm285_vm1, %v275_v5, %v519_v0  }
 0x120   : > { %v829_v0 = vmov %v287_v6  ;;  %292 = vst [vmem:[#allocation4] sm:$0xf] (%p21_p0), %v287_v6 }
 0x127   :  { %23 = sbr.rel (!%p21_p0) target bundleno = 2 (0x2), region = 58 }
 0x129   : > { %v456_v8 = vpop.eup %455 }
 0x12a   : > { %v277_v9 = vmul.f32 %v456_v8, %v454_v7 }
 0x12c   : > { %v286_v10 = vsel %vm285_vm1, %v277_v9, %v523_v1   ;;  %v288_v11 = vsel %vm285_vm1, %v277_v9, 0.0 }
 0x12d   : > { %290 = vst [vmem:[%s289_s14] sm:$0xf] %v288_v11  ;;  %v830_v1 = vmov %v286_v10  ;;  %291 = vst [vmem:[#allocation2] sm:$0xf] (%p21_p0), %v286_v10 }
 0x12e   :  { %468 = shalt.err (!%p465_p5)
}
 0x12f   :  { %s469_s18 = scalar_lea.hbm %s827_s4, 64 }
 0x130   :  { %p470_p6 = scmp.ne.s32.totalorder %s827_s4, %s469_s18  ;;  %p473_p7 = scmp.lt.u32.totalorder %s469_s18, %s827_s4 }
 0x132   :  { %p475_p8 = pnand %p473_p7, %p470_p6 }
 0x134   :  { %478 = shalt.err (!%p475_p8)
}
 0x135   :  { %304 = dma.vmem_to_hbm [thread:$0]  %s302_s16, 64, %s827_s4, [#allocation3]  }
 0x136   :  { %s479_s25 = scalar_lea.vmem %s312_s17, 64  ;;  %p484_p10 = scmp.lt.s32.totalorder %s312_s17, %s312_s17 }
 0x137   :  { %p480_p9 = scmp.ne.s32.totalorder %s312_s17, %s479_s25  ;;  %p485_p11 = scmp.lt.s32.totalorder %s479_s25, %s479_s25 }
 0x139   :  { %p486_p12 = por %p485_p11, %p484_p10 }
 0x13b   :  { %p487_p13 = pnand %p486_p12, %p480_p9 }
 0x13d   :  { %490 = shalt.err (!%p487_p13)
}
 0x13e   :  { %s491_s28 = scalar_lea.hbm %s828_s5, 64 }
 0x13f   :  { %p492_p0 = scmp.ne.s32.totalorder %s828_s5, %s491_s28  ;;  %p495_p1 = scmp.lt.u32.totalorder %s491_s28, %s828_s5 }
 0x141   :  { %p497_p2 = pnand %p495_p1, %p492_p0 }
 0x143   :  { %500 = shalt.err (!%p497_p2)
}
 0x144   :  { %314 = dma.vmem_to_hbm [thread:$0]  %s312_s17, 64, %s828_s5, [#allocation5]  }
 0x145   :  { %513 = dma.done.wait [#allocation3], 64  }
 0x146   :  { %514 = vsyncadd [#allocation3], 4294967232 }
 0x147   :  { %515 = dma.done.wait [#allocation5], 64  }
 0x148   :  { %516 = vsyncadd [#allocation5], 4294967232 }
 0x149   :  { %323 = vsyncpa [#allocation3], 1 }
 0x14a   :  { %324 = vsyncpa [#allocation5], 1 }

// kernel: ddrqn_apply.3
= control target key start
LH: loop header
LB: loop body
LE: loop exit
PB: predicated region body
PF: predicated region fallthrough
CT: control target
= control target key end

     0   :  { %12 = vsyncpa [#allocation3], 0  ;;  %s903_s0 = inlined_call_operand.vmem [shape: f32[32,8], index: 0, kind: input, shape index: {}]   ;;  %s904_s1 = inlined_call_operand.vmem [shape: f32[8,32], index: 1, kind: input, shape index: {}]   ;;  %s905_s2 = inlined_call_operand.vmem [shape: f32[1,32], index: 2, kind: input, shape index: {}]   ;;  %s906_s3 = inlined_call_operand.hbm [shape: f32[32,128], index: 3, kind: input, shape index: {}]   ;;  %s907_s4 = inlined_call_operand.vmem [shape: f32[1,128], index: 4, kind: input, shape index: {}]   ;;  %s908_s5 = inlined_call_operand.hbm [shape: f32[128,512], index: 5, kind: input, shape index: {}]   ;;  %s909_s6 = inlined_call_operand.vmem [shape: f32[1,512], index: 6, kind: input, shape index: {}]   ;;  %s910_s7 = inlined_call_operand.vmem [shape: f32[32,512], index: 7, kind: output, shape index: {}]  }
   0x1   :  { %13 = vsyncpa [#allocation5], 0  ;;  %s755_s24 = smov [#allocation2]   ;;  %s707_s28 = scalar_lea.hbm %s906_s3, 512 }
   0x2   :  { %s25_s25 = sshll.u32 %s755_s24, 4  ;;  %p708_p0 = scmp.ne.s32.totalorder %s906_s3, %s707_s28  ;;  %s26_s25 = int_to_ptr.vmem [resolvable:$true] %s25_s25 }
   0x3   :  { %p711_p1 = scmp.lt.u32.totalorder %s707_s28, %s906_s3 }
   0x5   :  { %p713_p2 = pnand %p711_p1, %p708_p0 }
   0x7   :  { %716 = shalt.err (!%p713_p2)
}
   0x8   :  { %s717_s10 = scalar_lea.vmem %s26_s25, 512  ;;  %p722_p4 = scmp.lt.s32.totalorder %s26_s25, %s26_s25 }
   0x9   :  { %p718_p3 = scmp.ne.s32.totalorder %s26_s25, %s717_s10  ;;  %p723_p5 = scmp.lt.s32.totalorder %s717_s10, %s717_s10 }
   0xb   :  { %p724_p6 = por %p723_p5, %p722_p4 }
   0xd   :  { %p725_p7 = pnand %p724_p6, %p718_p3 }
   0xf   :  { %728 = shalt.err (!%p725_p7)
}
  0x10   :  { %s756_s11 = smov 128   ;;  %s757_s12 = smov 8  }
  0x11   :  { %31 = dma.hbm_to_vmem [thread:$0]  %s906_s3, 512, %s26_s25, [#allocation3], %s756_s11, %s756_s11, %s757_s12  }
  0x12   :  { %s758_s15 = smov [#allocation4]   ;;  %s729_s19 = scalar_lea.hbm %s908_s5, 8192 }
  0x13   :  { %s39_s16 = sshll.u32 %s758_s15, 4  ;;  %p730_p8 = scmp.ne.s32.totalorder %s908_s5, %s729_s19  ;;  %s40_s16 = int_to_ptr.vmem [resolvable:$true] %s39_s16 }
  0x14   :  { %p733_p9 = scmp.lt.u32.totalorder %s729_s19, %s908_s5 }
  0x16   :  { %p735_p10 = pnand %p733_p9, %p730_p8 }
  0x18   :  { %738 = shalt.err (!%p735_p10)
}
  0x19   :  { %s739_s24 = scalar_lea.vmem %s40_s16, 8192  ;;  %p744_p12 = scmp.lt.s32.totalorder %s40_s16, %s40_s16 }
  0x1a   :  { %p740_p11 = scmp.ne.s32.totalorder %s40_s16, %s739_s24  ;;  %p745_p13 = scmp.lt.s32.totalorder %s739_s24, %s739_s24 }
  0x1c   :  { %p746_p0 = por %p745_p13, %p744_p12 }
  0x1e   :  { %p747_p1 = pnand %p746_p0, %p740_p11 }
  0x20   :  { %750 = shalt.err (!%p747_p1)
}
  0x21   :  { %s759_s3 = smov 512   ;;  %s760_s25 = smov 32  }
  0x22   :  { %45 = dma.hbm_to_vmem [thread:$0]  %s908_s5, 8192, %s40_s16, [#allocation5], %s759_s3, %s759_s3, %s760_s25  }
  0x23   :  { %751 = dma.done.wait [#allocation3], 512  }
  0x24   :  { %752 = vsyncadd [#allocation3], 4294966784 }
  0x25   :  { %753 = dma.done.wait [#allocation5], 8192  }
  0x26   :  { %754 = vsyncadd [#allocation5], 4294959104  ;;  %vm66_vm0 = vcmask 64512   ;;  %v58_v0 = vld [vmem:[%s904_s1] sm:$0xff]  ;;  %v55_v2 = vld [vmem:[%s903_s0 + $0x8] sm:$0xff]  ;;  %vm187_vm3 = vcmask 261120  }
  0x27   :  { %v54_v1 = vld [vmem:[%s903_s0] sm:$0xff]  ;;  %606 = vmatprep.subr.mxu0 %v58_v0  ;;  %v56_v3 = vld [vmem:[%s903_s0 + $0x10] sm:$0xff]  ;;  %v57_v4 = vld [vmem:[%s903_s0 + $0x18] sm:$0xff] }
  0x28   :  { %608 = vmatprep.mubr.msk.f32.mxu0 %vm66_vm0, %v54_v1  ;;  %607 = vmatpush3.msra.mxu0 %v58_v0  ;;  %v176_v5 = vld [vmem:[#allocation2] sm:$0xff]  ;;  %v177_v6 = vld [vmem:[#allocation2 + $0x8] sm:$0xff]  ;;  %v178_v8 = vld [vmem:[#allocation2 + $0x10] sm:$0xff] }
  0x29   :  { %609 = vmatmul.mubr.msk.f32.vlgmr.msra.gmra.mrb[0].mxu0 %vm66_vm0, %v55_v2  ;;  %v628_v7 = vpack.c.bf16 %v177_v6, %v176_v5  ;;  %v179_v9 = vld [vmem:[#allocation2 + $0x18] sm:$0xff]  ;;  %v298_v11 = vld [vmem:[#allocation4 + $0x8] sm:$0xff]  ;;  %v297_v16 = vld [vmem:[#allocation4] sm:$0xff] }
  0x2a   :  { %611 = vmatprep.mubr.msk.f32.mxu0 %vm66_vm0, %v56_v3  ;;  %v632_v10 = vpack.c.bf16 %v179_v9, %v178_v8  ;;  %v302_v12 = vld [vmem:[#allocation4 + $0x28] sm:$0xff]  ;;  %v300_v13 = vld [vmem:[#allocation4 + $0x18] sm:$0xff]  ;;  %v301_v17 = vld [vmem:[#allocation4 + $0x20] sm:$0xff] }
  0x2b   :  { %629 = vmatprep.subr.bf16.mxu1 %v628_v7  ;;  %v636_v14 = vpack.c.bf16 %v302_v12, %v298_v11  ;;  %v304_v15 = vld [vmem:[#allocation4 + $0x38] sm:$0xff]  ;;  %v638_v19 = vpack.c.bf16 %v301_v17, %v297_v16  ;;  %v306_v20 = vld [vmem:[#allocation4 + $0x48] sm:$0xff]  ;;  %v305_v23 = vld [vmem:[#allocation4 + $0x40] sm:$0xff] }
  0x2c   :  { %631 = vmatpush3.bf16.msra.mxu1 %v628_v7  ;;  %v668_v18 = vpack.c.bf16 %v304_v15, %v300_v13  ;;  %v310_v21 = vld [vmem:[#allocation4 + $0x68] sm:$0xff]  ;;  %v309_v24 = vld [vmem:[#allocation4 + $0x60] sm:$0xff]  ;;  %v299_v58 = vld [vmem:[#allocation4 + $0x10] sm:$0xff] }
  0x2d   :  { %612 = vmatmul.mubr.msk.f32.gmra.mrb[2].mxu0 %vm66_vm0, %v57_v4  ;;  %633 = vmatprep.subr.bf16.mxu1 %v632_v10  ;;  %v640_v22 = vpack.c.bf16 %v310_v21, %v306_v20  ;;  %v642_v25 = vpack.c.bf16 %v309_v24, %v305_v23  ;;  %v314_v26 = vld [vmem:[#allocation4 + $0x88] sm:$0xff]  ;;  %v313_v29 = vld [vmem:[#allocation4 + $0x80] sm:$0xff]  ;;  %v303_v59 = vld [vmem:[#allocation4 + $0x30] sm:$0xff] }
  0x2e   :  { %637 = vmatprep.subr.bf16.mxu0 %v636_v14  ;;  %v318_v27 = vld [vmem:[#allocation4 + $0xa8] sm:$0xff]  ;;  %v317_v30 = vld [vmem:[#allocation4 + $0xa0] sm:$0xff]  ;;  %v308_v61 = vld [vmem:[#allocation4 + $0x58] sm:$0xff]  ;;  %v670_v3 = vpack.c.bf16 %v303_v59, %v299_v58 }
  0x2f   :  { %639 = vmatpush1.bf16.msra.mxu0 %v638_v19  ;;  %v644_v28 = vpack.c.bf16 %v318_v27, %v314_v26  ;;  %v646_v31 = vpack.c.bf16 %v317_v30, %v313_v29  ;;  %v322_v32 = vld [vmem:[#allocation4 + $0xc8] sm:$0xff]  ;;  %v321_v35 = vld [vmem:[#allocation4 + $0xc0] sm:$0xff]  ;;  %v312_v62 = vld [vmem:[#allocation4 + $0x78] sm:$0xff] }
  0x30   :  { %635 = vmatpush3.bf16.msra.mxu1 %v632_v10  ;;  %641 = vmatprep.subr.bf16.mxu0 %v640_v22  ;;  %v326_v33 = vld [vmem:[#allocation4 + $0xe8] sm:$0xff]  ;;  %v325_v36 = vld [vmem:[#allocation4 + $0xe0] sm:$0xff]  ;;  %v672_v6 = vpack.c.bf16 %v312_v62, %v308_v61  ;;  %v307_v7 = vld [vmem:[#allocation4 + $0x50] sm:$0xff] }
  0x31   :  { %669 = vmatprep.subr.bf16.mxu1 %v668_v18  ;;  %v648_v34 = vpack.c.bf16 %v326_v33, %v322_v32  ;;  %v330_v37 = vld [vmem:[#allocation4 + $0x108] sm:$0xff]  ;;  %v650_v39 = vpack.c.bf16 %v325_v36, %v321_v35  ;;  %v329_v41 = vld [vmem:[#allocation4 + $0x100] sm:$0xff]  ;;  %v311_v8 = vld [vmem:[#allocation4 + $0x70] sm:$0xff] }
  0x32   :  { %v334_v38 = vld [vmem:[#allocation4 + $0x128] sm:$0xff]  ;;  %v333_v42 = vld [vmem:[#allocation4 + $0x120] sm:$0xff]  ;;  %v316_v11 = vld [vmem:[#allocation4 + $0x98] sm:$0xff]  ;;  %v674_v15 = vpack.c.bf16 %v311_v8, %v307_v7 }
  0x33   :  { %643 = vmatpush1.bf16.msra.mxu0 %v642_v25  ;;  %v652_v40 = vpack.c.bf16 %v334_v38, %v330_v37  ;;  %v338_v43 = vld [vmem:[#allocation4 + $0x148] sm:$0xff]  ;;  %v654_v45 = vpack.c.bf16 %v333_v42, %v329_v41  ;;  %v337_v47 = vld [vmem:[#allocation4 + $0x140] sm:$0xff]  ;;  %v320_v12 = vld [vmem:[#allocation4 + $0xb8] sm:$0xff] }
  0x34   :  { %645 = vmatprep.subr.bf16.mxu0 %v644_v28  ;;  %v342_v44 = vld [vmem:[#allocation4 + $0x168] sm:$0xff]  ;;  %v341_v48 = vld [vmem:[#allocation4 + $0x160] sm:$0xff]  ;;  %v676_v17 = vpack.c.bf16 %v320_v12, %v316_v11  ;;  %v315_v18 = vld [vmem:[#allocation4 + $0x90] sm:$0xff] }
  0x35   :  { %v656_v46 = vpack.c.bf16 %v342_v44, %v338_v43  ;;  %v346_v49 = vld [vmem:[#allocation4 + $0x188] sm:$0xff]  ;;  %v658_v51 = vpack.c.bf16 %v341_v48, %v337_v47  ;;  %v583_v53 = vld [vmem:[%s905_s2] ss:$0 sm:$0xff]  ;;  %v319_v19 = vld [vmem:[#allocation4 + $0xb0] sm:$0xff] }
  0x36   :  { %v350_v50 = vld [vmem:[#allocation4 + $0x1a8] sm:$0xff]  ;;  %v324_v20 = vld [vmem:[#allocation4 + $0xd8] sm:$0xff]  ;;  %v678_v22 = vpack.c.bf16 %v319_v19, %v315_v18  ;;  %v323_v24 = vld [vmem:[#allocation4 + $0xd0] sm:$0xff] }
  0x37   :  { %647 = vmatpush1.bf16.msra.mxu0 %v646_v31  ;;  %v660_v52 = vpack.c.bf16 %v350_v50, %v346_v49  ;;  %v328_v21 = vld [vmem:[#allocation4 + $0xf8] sm:$0xff]  ;;  %v327_v25 = vld [vmem:[#allocation4 + $0xf0] sm:$0xff]  ;;  %v345_v42 = vld [vmem:[#allocation4 + $0x180] sm:$0xff] }
  0x38   :  { %649 = vmatprep.subr.bf16.mxu0 %v648_v34  ;;  %v680_v23 = vpack.c.bf16 %v328_v21, %v324_v20  ;;  %v332_v26 = vld [vmem:[#allocation4 + $0x118] sm:$0xff]  ;;  %v682_v28 = vpack.c.bf16 %v327_v25, %v323_v24  ;;  %v331_v30 = vld [vmem:[#allocation4 + $0x110] sm:$0xff]  ;;  %v349_v43 = vld [vmem:[#allocation4 + $0x1a0] sm:$0xff] }
  0x39   :  { %v336_v27 = vld [vmem:[#allocation4 + $0x138] sm:$0xff]  ;;  %v335_v31 = vld [vmem:[#allocation4 + $0x130] sm:$0xff]  ;;  %v354_v48 = vld [vmem:[#allocation4 + $0x1c8] sm:$0xff] }
  0x3a   :  { %v684_v29 = vpack.c.bf16 %v336_v27, %v332_v26  ;;  %v340_v32 = vld [vmem:[#allocation4 + $0x158] sm:$0xff]  ;;  %v686_v34 = vpack.c.bf16 %v335_v31, %v331_v30  ;;  %v339_v36 = vld [vmem:[#allocation4 + $0x150] sm:$0xff]  ;;  %v358_v49 = vld [vmem:[#allocation4 + $0x1e8] sm:$0xff] }
  0x3b   :  { %651 = vmatpush1.bf16.msra.mxu0 %v650_v39  ;;  %v344_v33 = vld [vmem:[#allocation4 + $0x178] sm:$0xff]  ;;  %v343_v37 = vld [vmem:[#allocation4 + $0x170] sm:$0xff]  ;;  %v664_v50 = vpack.c.bf16 %v358_v49, %v354_v48  ;;  %v588_v61 = vld [vmem:[%s907_s4] ss:$0 sm:$0xff] }
  0x3c   :  { %653 = vmatprep.subr.bf16.mxu0 %v652_v40  ;;  %v688_v35 = vpack.c.bf16 %v344_v33, %v340_v32  ;;  %v348_v38 = vld [vmem:[#allocation4 + $0x198] sm:$0xff]  ;;  %v690_v40 = vpack.c.bf16 %v343_v37, %v339_v36  ;;  %v347_v44 = vld [vmem:[#allocation4 + $0x190] sm:$0xff]  ;;  %v361_v18 = vld [vmem:[%s909_s6] sm:$0xf] }
  0x3d   :  { %v352_v39 = vld [vmem:[#allocation4 + $0x1b8] sm:$0xff] }
  0x3e   :  { %v692_v41 = vpack.c.bf16 %v352_v39, %v348_v38 }
  0x3f   :  { %655 = vmatpush1.bf16.msra.mxu0 %v654_v45  ;;  %v662_v45 = vpack.c.bf16 %v349_v43, %v345_v42 }
  0x40   :  { %657 = vmatprep.subr.bf16.mxu0 %v656_v46  ;;  %v351_v46 = vld [vmem:[#allocation4 + $0x1b0] sm:$0xff] }
  0x41   :  { %v694_v47 = vpack.c.bf16 %v351_v46, %v347_v44 }
  0x43   :  { %659 = vmatpush1.bf16.msra.mxu0 %v658_v51  ;;  %v356_v51 = vld [vmem:[#allocation4 + $0x1d8] sm:$0xff] }
  0x44   :  { %661 = vmatprep.subr.bf16.mxu0 %v660_v52  ;;  %v360_v52 = vld [vmem:[#allocation4 + $0x1f8] sm:$0xff] }
  0x47   :  { %663 = vmatpush1.bf16.msra.mxu0 %v662_v45 }
  0x48   :  { %665 = vmatprep.subr.bf16.mxu0 %v664_v50 }
  0xfc   :  { %v610_v54 = vpop.f32.mrb[0].mxu0 }
  0xfd   :  { %v151_v55 = vadd.f32 %v610_v54, %v583_v53  ;;  %v145_v56 = vpop.f32.mrb[1].mxu0  ;;  %v696_v54 = vpack.c.bf16 %v360_v52, %v356_v51 }
  0xfe   :  { %v146_v57 = vadd.f32 %v583_v53, %v145_v56  ;;  %v355_v56 = vld [vmem:[#allocation4 + $0x1d0] sm:$0xff] }
  0xff   :  { %v169_v60 = vmul.f32 0.01, %v151_v55  ;;  %vm165_vm1 = vcmp.gt.f32.partialorder %v151_v55, 0.0 }
 0x100   :  { %v613_v63 = vpop.f32.mrb[2].mxu0  ;;  %vm164_vm2 = vcmp.gt.f32.partialorder %v146_v57, 0.0  ;;  %v168_v0 = vmul.f32 0.01, %v146_v57 }
 0x101   :  { %v161_v1 = vadd.f32 %v613_v63, %v583_v53  ;;  %v155_v2 = vpop.f32.mrb[3].mxu0  ;;  %v173_v10 = vsel %vm165_vm1, %v151_v55, %v169_v60  ;;  %v357_v55 = vld [vmem:[#allocation4 + $0x1e0] sm:$0xff]  ;;  %v761_v60 = vmov 0.0  }
 0x102   :  { %v156_v4 = vadd.f32 %v583_v53, %v155_v2  ;;  %v172_v5 = vsel %vm164_vm2, %v146_v57, %v168_v0  ;;  %v353_v53 = vld [vmem:[#allocation4 + $0x1c0] sm:$0xff]  ;;  %v359_v57 = vld [vmem:[#allocation4 + $0x1f0] sm:$0xff]  ;;  %447 = vmatprep.mubr.f32.mxu0 %v761_v60 }
 0x103   :  { %vm167_vm4 = vcmp.gt.f32.partialorder %v161_v1, 0.0  ;;  %v171_v9 = vmul.f32 0.01, %v161_v1  ;;  %622 = vmatprep.mubr.msk.f32.mxu1 %vm187_vm3, %v172_v5  ;;  %v666_v58 = vpack.c.bf16 %v357_v55, %v353_v53  ;;  %v698_v59 = vpack.c.bf16 %v359_v57, %v355_v56 }
 0x104   :  { %vm166_vm5 = vcmp.gt.f32.partialorder %v156_v4, 0.0  ;;  %v170_v13 = vmul.f32 0.01, %v156_v4  ;;  %623 = vmatmul.mubr.msk.f32.vlgmr.msra.gmra.mrb[0].mxu1 %vm187_vm3, %v173_v10 }
 0x105   :  { %v175_v14 = vsel %vm167_vm4, %v161_v1, %v171_v9  ;;  %671 = vmatpush1.bf16.msra.mxu1 %v670_v3  ;;  %667 = vmatpush1.bf16.msra.mxu0 %v666_v58 }
 0x106   :  { %v174_v16 = vsel %vm166_vm5, %v156_v4, %v170_v13  ;;  %673 = vmatprep.subr.bf16.mxu1 %v672_v6 }
 0x107   :  { %625 = vmatprep.mubr.msk.f32.mxu1 %vm187_vm3, %v174_v16 }
 0x108   :  { %626 = vmatmul.mubr.msk.f32.gmra.mrb[2].mxu1 %vm187_vm3, %v175_v14  ;;  %v363_v14 = vlaneseq }
 0x109   :  { %675 = vmatpush1.bf16.msra.mxu1 %v674_v15  ;;  %536 = vmatprep.mubr.f32.mxu1 %v761_v60 }
 0x10a   :  { %677 = vmatprep.subr.bf16.mxu1 %v676_v17  ;;  %v364_v15 = vshrl.u32 %v363_v14, 7 }
 0x10c   :  { %v365_v16 = vsub.s32 0, %v364_v15  ;;  %v373_v17 = vsub.s32 2, %v364_v15  ;;  %v369_v19 = vsub.s32 1, %v364_v15  ;;  %v377_v20 = vsub.s32 3, %v364_v15 }
 0x10d   :  { %679 = vmatpush1.bf16.msra.mxu1 %v678_v22 }
 0x10e   :  { %681 = vmatprep.subr.bf16.mxu1 %v680_v23  ;;  %v366_v21 = vrot.slane %v361_v18, %v365_v16  ;;  %v374_v22 = vrot.slane %v361_v18, %v373_v17  ;;  %v370_v23 = vrot.slane %v361_v18, %v369_v19  ;;  %v378_v24 = vrot.slane %v361_v18, %v377_v20 }
 0x111   :  { %683 = vmatpush1.bf16.msra.mxu1 %v682_v28 }
 0x112   :  { %685 = vmatprep.subr.bf16.mxu1 %v684_v29 }
 0x115   :  { %687 = vmatpush1.bf16.msra.mxu1 %v686_v34 }
 0x116   :  { %689 = vmatprep.subr.bf16.mxu1 %v688_v35 }
 0x119   :  { %691 = vmatpush1.bf16.msra.mxu1 %v690_v40 }
 0x11a   :  { %693 = vmatprep.subr.bf16.mxu1 %v692_v41 }
 0x11d   :  { %695 = vmatpush1.bf16.msra.mxu1 %v694_v47 }
 0x11e   :  { %697 = vmatprep.subr.bf16.mxu1 %v696_v54 }
 0x121   :  { %699 = vmatpush1.bf16.msra.mxu1 %v698_v59 }
 0x1d7   :  { %v624_v62 = vpop.f32.mrb[0].mxu1 }
 0x1d8   :  { %v266_v63 = vpop.f32.mrb[1].mxu1  ;;  %v272_v0 = vadd.f32 %v624_v62, %v588_v61 }
 0x1d9   :  { %v267_v1 = vadd.f32 %v588_v61, %v266_v63 }
 0x1da   :  { %v290_v5 = vmul.f32 0.01, %v272_v0  ;;  %vm286_vm7 = vcmp.gt.f32.partialorder %v272_v0, 0.0 }
 0x1db   :  { %vm285_vm6 = vcmp.gt.f32.partialorder %v267_v1, 0.0  ;;  %v289_v2 = vmul.f32 0.01, %v267_v1  ;;  %v627_v3 = vpop.f32.mrb[2].mxu1 }
 0x1dc   :  { %v276_v4 = vpop.f32.mrb[3].mxu1  ;;  %v282_v8 = vadd.f32 %v627_v3, %v588_v61  ;;  %v294_v10 = vsel %vm286_vm7, %v272_v0, %v290_v5 }
 0x1dd   :  { %v293_v6 = vsel %vm285_vm6, %v267_v1, %v289_v2  ;;  %v277_v7 = vadd.f32 %v588_v61, %v276_v4 }
 0x1de   :  { %448 = vmatmul.mubr.f32.vlgmr.msra.gmra.mrb[4].mxu0 %v293_v6  ;;  %537 = vmatmul.mubr.f32.vlgmr.msra.gmra.mrb[4].mxu1 %v293_v6  ;;  %v292_v11 = vmul.f32 0.01, %v282_v8  ;;  %vm288_vm9 = vcmp.gt.f32.partialorder %v282_v8, 0.0 }
 0x1df   :  { %453 = vmatprep.mubr.f32.mxu0 %v761_v60  ;;  %542 = vmatprep.mubr.f32.mxu1 %v761_v60  ;;  %v291_v9 = vmul.f32 0.01, %v277_v7  ;;  %vm287_vm8 = vcmp.gt.f32.partialorder %v277_v7, 0.0 }
 0x1e0   :  { %v296_v13 = vsel %vm288_vm9, %v282_v8, %v292_v11 }
 0x1e1   :  { %v295_v12 = vsel %vm287_vm8, %v277_v7, %v291_v9 }
 0x1e2   :  { %454 = vmatmul.mubr.f32.gmra.mrb[6].mxu0 %v294_v10  ;;  %543 = vmatmul.mubr.f32.gmra.mrb[6].mxu1 %v294_v10 }
 0x1e3   :  { %459 = vmatprep.mubr.f32.mxu0 %v761_v60  ;;  %548 = vmatprep.mubr.f32.mxu1 %v761_v60 }
 0x1e6   :  { %460 = vmatmul.mubr.f32.gmra.mrb[8].mxu0 %v295_v12  ;;  %549 = vmatmul.mubr.f32.gmra.mrb[8].mxu1 %v295_v12 }
 0x1e7   :  { %465 = vmatprep.mubr.f32.mxu0 %v761_v60  ;;  %554 = vmatprep.mubr.f32.mxu1 %v761_v60 }
 0x1ea   :  { %466 = vmatmul.mubr.f32.gmra.mrb[10].mxu0 %v296_v13  ;;  %555 = vmatmul.mubr.f32.gmra.mrb[10].mxu1 %v296_v13 }
 0x2b1   :  { %v449_v25 = vpop.f32.mrb[4].mxu0  ;;  %v538_v26 = vpop.f32.mrb[4].mxu1 }
 0x2b2   :  { %v450_v27 = vadd.f32 %v449_v25, %v366_v21  ;;  %v539_v28 = vadd.f32 %v538_v26, %v374_v22  ;;  %v451_v29 = vpop.f32.mrb[5].mxu0  ;;  %v540_v30 = vpop.f32.mrb[5].mxu1 }
 0x2b3   :  { %v452_v31 = vadd.f32 %v451_v29, %v370_v23  ;;  %v541_v32 = vadd.f32 %v540_v30, %v378_v24 }
 0x2b4   :  { %561 = vst [vmem:[%s910_s7] sm:$0xff] %v450_v27  ;;  %563 = vst [vmem:[%s910_s7 + $0x10] sm:$0xff] %v539_v28 }
 0x2b5   :  { %562 = vst [vmem:[%s910_s7 + $0x8] sm:$0xff] %v452_v31  ;;  %564 = vst [vmem:[%s910_s7 + $0x18] sm:$0xff] %v541_v32  ;;  %v455_v33 = vpop.f32.mrb[6].mxu0  ;;  %v544_v34 = vpop.f32.mrb[6].mxu1 }
 0x2b6   :  { %v456_v35 = vadd.f32 %v455_v33, %v366_v21  ;;  %v545_v36 = vadd.f32 %v544_v34, %v374_v22  ;;  %v457_v37 = vpop.f32.mrb[7].mxu0  ;;  %v546_v38 = vpop.f32.mrb[7].mxu1 }
 0x2b7   :  { %v458_v39 = vadd.f32 %v457_v37, %v370_v23  ;;  %v547_v40 = vadd.f32 %v546_v38, %v378_v24 }
 0x2b8   :  { %565 = vst [vmem:[%s910_s7 + $0x20] sm:$0xff] %v456_v35  ;;  %567 = vst [vmem:[%s910_s7 + $0x30] sm:$0xff] %v545_v36 }
 0x2b9   :  { %566 = vst [vmem:[%s910_s7 + $0x28] sm:$0xff] %v458_v39  ;;  %568 = vst [vmem:[%s910_s7 + $0x38] sm:$0xff] %v547_v40  ;;  %v461_v41 = vpop.f32.mrb[8].mxu0  ;;  %v550_v42 = vpop.f32.mrb[8].mxu1 }
 0x2ba   :  { %v462_v43 = vadd.f32 %v461_v41, %v366_v21  ;;  %v551_v44 = vadd.f32 %v550_v42, %v374_v22  ;;  %v463_v45 = vpop.f32.mrb[9].mxu0  ;;  %v552_v46 = vpop.f32.mrb[9].mxu1 }
 0x2bb   :  { %v464_v47 = vadd.f32 %v463_v45, %v370_v23  ;;  %v553_v48 = vadd.f32 %v552_v46, %v378_v24 }
 0x2bc   :  { %569 = vst [vmem:[%s910_s7 + $0x40] sm:$0xff] %v462_v43  ;;  %571 = vst [vmem:[%s910_s7 + $0x50] sm:$0xff] %v551_v44 }
 0x2bd   :  { %570 = vst [vmem:[%s910_s7 + $0x48] sm:$0xff] %v464_v47  ;;  %572 = vst [vmem:[%s910_s7 + $0x58] sm:$0xff] %v553_v48  ;;  %v467_v49 = vpop.f32.mrb[10].mxu0  ;;  %v556_v50 = vpop.f32.mrb[10].mxu1 }
 0x2be   :  { %v468_v51 = vadd.f32 %v467_v49, %v366_v21  ;;  %v557_v52 = vadd.f32 %v556_v50, %v374_v22  ;;  %v469_v53 = vpop.f32.mrb[11].mxu0  ;;  %v558_v54 = vpop.f32.mrb[11].mxu1 }
 0x2bf   :  { %v470_v55 = vadd.f32 %v469_v53, %v370_v23  ;;  %v559_v56 = vadd.f32 %v558_v54, %v378_v24 }
 0x2c0   :  { %573 = vst [vmem:[%s910_s7 + $0x60] sm:$0xff] %v468_v51  ;;  %575 = vst [vmem:[%s910_s7 + $0x70] sm:$0xff] %v557_v52 }
 0x2c1   :  { %574 = vst [vmem:[%s910_s7 + $0x68] sm:$0xff] %v470_v55  ;;  %576 = vst [vmem:[%s910_s7 + $0x78] sm:$0xff] %v559_v56 }
 0x2c2   :  { %581 = vsyncpa [#allocation3], 1 }
 0x2c3   :  { %582 = vsyncpa [#allocation5], 1 }

// kernel: ddrqn_apply.5
= control target key start
LH: loop header
LB: loop body
LE: loop exit
PB: predicated region body
PF: predicated region fallthrough
CT: control target
= control target key end

     0   :  { %vm155_vm2 = vcmask 261120   ;;  %s507_s1 = inlined_call_operand.vmem [shape: f32[128,32], index: 1, kind: input, shape index: {}]   ;;  %s508_s0 = inlined_call_operand.vmem [shape: f32[32,128], index: 0, kind: input, shape index: {}]   ;;  %s509_s3 = inlined_call_operand.vmem [shape: f32[32,128], index: 3, kind: input, shape index: {}]   ;;  %s510_s2 = inlined_call_operand.vmem [shape: f32[1,32], index: 2, kind: input, shape index: {}]   ;;  %s511_s4 = inlined_call_operand.vmem [shape: f32[1,128], index: 4, kind: input, shape index: {}]   ;;  %s512_s5 = inlined_call_operand.vmem [shape: f32[32,128], index: 5, kind: output, shape index: {}]  }
   0x1   :  { %v24_v0 = vld [vmem:[%s507_s1] sm:$0xff]  ;;  %v25_v1 = vld [vmem:[%s507_s1 + $0x8] sm:$0xff]  ;;  %v26_v2 = vld [vmem:[%s507_s1 + $0x10] sm:$0xff] }
   0x2   :  { %v347_v3 = vpack.c.bf16 %v25_v1, %v24_v0  ;;  %v27_v4 = vld [vmem:[%s507_s1 + $0x18] sm:$0xff]  ;;  %v28_v6 = vld [vmem:[%s507_s1 + $0x20] sm:$0xff]  ;;  %v29_v7 = vld [vmem:[%s507_s1 + $0x28] sm:$0xff] }
   0x3   :  { %v351_v5 = vpack.c.bf16 %v27_v4, %v26_v2  ;;  %v355_v8 = vpack.c.bf16 %v29_v7, %v28_v6  ;;  %v20_v9 = vld [vmem:[%s508_s0] sm:$0xff]  ;;  %v30_v10 = vld [vmem:[%s507_s1 + $0x30] sm:$0xff]  ;;  %v31_v11 = vld [vmem:[%s507_s1 + $0x38] sm:$0xff] }
   0x4   :  { %348 = vmatprep.subr.bf16.mxu0 %v347_v3  ;;  %327 = vmatprep.mubr.f32.mxu0 %v20_v9  ;;  %v359_v12 = vpack.c.bf16 %v31_v11, %v30_v10  ;;  %v32_v13 = vld [vmem:[%s507_s1 + $0x40] sm:$0xff]  ;;  %v33_v14 = vld [vmem:[%s507_s1 + $0x48] sm:$0xff]  ;;  %v34_v16 = vld [vmem:[%s507_s1 + $0x50] sm:$0xff] }
   0x5   :  { %350 = vmatpush3.bf16.msra.mxu0 %v347_v3  ;;  %v363_v15 = vpack.c.bf16 %v33_v14, %v32_v13  ;;  %v35_v17 = vld [vmem:[%s507_s1 + $0x58] sm:$0xff]  ;;  %v36_v19 = vld [vmem:[%s507_s1 + $0x60] sm:$0xff]  ;;  %v37_v20 = vld [vmem:[%s507_s1 + $0x68] sm:$0xff] }
   0x6   :  { %352 = vmatprep.subr.bf16.mxu0 %v351_v5  ;;  %v367_v18 = vpack.c.bf16 %v35_v17, %v34_v16  ;;  %v371_v21 = vpack.c.bf16 %v37_v20, %v36_v19  ;;  %v38_v22 = vld [vmem:[%s507_s1 + $0x70] sm:$0xff]  ;;  %v39_v23 = vld [vmem:[%s507_s1 + $0x78] sm:$0xff]  ;;  %v21_v25 = vld [vmem:[%s508_s0 + $0x8] sm:$0xff] }
   0x7   :  { %v375_v24 = vpack.c.bf16 %v39_v23, %v38_v22  ;;  %v22_v26 = vld [vmem:[%s508_s0 + $0x10] sm:$0xff]  ;;  %v23_v27 = vld [vmem:[%s508_s0 + $0x18] sm:$0xff]  ;;  %v144_v28 = vld [vmem:[%s509_s3] sm:$0xff] }
   0x8   :  { %v145_v29 = vld [vmem:[%s509_s3 + $0x8] sm:$0xff]  ;;  %v146_v31 = vld [vmem:[%s509_s3 + $0x10] sm:$0xff]  ;;  %v147_v32 = vld [vmem:[%s509_s3 + $0x18] sm:$0xff] }
   0x9   :  { %354 = vmatpush3.bf16.msra.mxu0 %v351_v5  ;;  %v379_v30 = vpack.c.bf16 %v145_v29, %v144_v28  ;;  %v383_v33 = vpack.c.bf16 %v147_v32, %v146_v31  ;;  %v261_v34 = vld [vmem:[%s510_s2] ss:$0 sm:$0xff] }
   0xa   :  { %356 = vmatprep.subr.bf16.mxu0 %v355_v8  ;;  %v262_v51 = vld [vmem:[%s511_s4] ss:$0 sm:$0xff] }
   0xb   :  { %380 = vmatprep.subr.bf16.mxu1 %v379_v30 }
   0xc   :  { %382 = vmatpush3.bf16.msra.mxu1 %v379_v30 }
   0xd   :  { %358 = vmatpush3.bf16.msra.mxu0 %v355_v8  ;;  %384 = vmatprep.subr.bf16.mxu1 %v383_v33 }
   0xe   :  { %360 = vmatprep.subr.bf16.mxu0 %v359_v12 }
  0x10   :  { %386 = vmatpush3.bf16.msra.mxu1 %v383_v33 }
  0x11   :  { %362 = vmatpush3.bf16.msra.mxu0 %v359_v12 }
  0x12   :  { %364 = vmatprep.subr.bf16.mxu0 %v363_v15 }
  0x15   :  { %366 = vmatpush3.bf16.msra.mxu0 %v363_v15 }
  0x16   :  { %368 = vmatprep.subr.bf16.mxu0 %v367_v18 }
  0x19   :  { %370 = vmatpush3.bf16.msra.mxu0 %v367_v18 }
  0x1a   :  { %372 = vmatprep.subr.bf16.mxu0 %v371_v21 }
  0x1d   :  { %374 = vmatpush3.bf16.msra.mxu0 %v371_v21 }
  0x1e   :  { %376 = vmatprep.subr.bf16.mxu0 %v375_v24 }
  0x21   :  { %378 = vmatpush3.bf16.msra.mxu0 %v375_v24 }
  0x24   :  { %328 = vmatmul.mubr.f32.vlgmr.msra.gmra.mrb[0].mxu0 %v21_v25 }
  0x25   :  { %330 = vmatprep.mubr.f32.mxu0 %v22_v26 }
  0x28   :  { %331 = vmatmul.mubr.f32.gmra.mrb[2].mxu0 %v23_v27 }
  0xf7   :  { %v329_v35 = vpop.f32.mrb[0].mxu0 }
  0xf8   :  { %v119_v36 = vadd.f32 %v329_v35, %v261_v34  ;;  %v113_v37 = vpop.f32.mrb[1].mxu0 }
  0xf9   :  { %v114_v38 = vadd.f32 %v261_v34, %v113_v37 }
  0xfa   :  { %v137_v39 = vmul.f32 0.01, %v119_v36  ;;  %vm133_vm0 = vcmp.gt.f32.partialorder %v119_v36, 0.0 }
  0xfb   :  { %v332_v40 = vpop.f32.mrb[2].mxu0  ;;  %vm132_vm1 = vcmp.gt.f32.partialorder %v114_v38, 0.0  ;;  %v136_v41 = vmul.f32 0.01, %v114_v38 }
  0xfc   :  { %v129_v42 = vadd.f32 %v332_v40, %v261_v34  ;;  %v123_v43 = vpop.f32.mrb[3].mxu0  ;;  %v141_v47 = vsel %vm133_vm0, %v119_v36, %v137_v39 }
  0xfd   :  { %v124_v44 = vadd.f32 %v261_v34, %v123_v43  ;;  %v140_v45 = vsel %vm132_vm1, %v114_v38, %v136_v41 }
  0xfe   :  { %v139_v46 = vmul.f32 0.01, %v129_v42  ;;  %341 = vmatprep.mubr.msk.f32.mxu1 %vm155_vm2, %v140_v45  ;;  %vm135_vm3 = vcmp.gt.f32.partialorder %v129_v42, 0.0 }
  0xff   :  { %vm134_vm4 = vcmp.gt.f32.partialorder %v124_v44, 0.0  ;;  %v138_v48 = vmul.f32 0.01, %v124_v44  ;;  %342 = vmatmul.mubr.msk.f32.vlgmr.msra.gmra.mrb[0].mxu1 %vm155_vm2, %v141_v47 }
 0x100   :  { %v143_v50 = vsel %vm135_vm3, %v129_v42, %v139_v46 }
 0x101   :  { %v142_v49 = vsel %vm134_vm4, %v124_v44, %v138_v48 }
 0x102   :  { %344 = vmatprep.mubr.msk.f32.mxu1 %vm155_vm2, %v142_v49 }
 0x103   :  { %345 = vmatmul.mubr.msk.f32.gmra.mrb[2].mxu1 %vm155_vm2, %v143_v50 }
 0x1d2   :  { %v343_v52 = vpop.f32.mrb[0].mxu1 }
 0x1d3   :  { %v240_v53 = vadd.f32 %v343_v52, %v262_v51  ;;  %v234_v54 = vpop.f32.mrb[1].mxu1 }
 0x1d4   :  { %v235_v55 = vadd.f32 %v262_v51, %v234_v54 }
 0x1d5   :  { %254 = vst [vmem:[%s512_s5 + $0x8] sm:$0xff] %v240_v53 }
 0x1d6   :  { %253 = vst [vmem:[%s512_s5] sm:$0xff] %v235_v55  ;;  %v346_v56 = vpop.f32.mrb[2].mxu1 }
 0x1d7   :  { %v250_v57 = vadd.f32 %v346_v56, %v262_v51  ;;  %v244_v58 = vpop.f32.mrb[3].mxu1 }
 0x1d8   :  { %v245_v59 = vadd.f32 %v262_v51, %v244_v58 }
 0x1d9   :  { %256 = vst [vmem:[%s512_s5 + $0x18] sm:$0xff] %v250_v57 }
 0x1da   :  { %255 = vst [vmem:[%s512_s5 + $0x10] sm:$0xff] %v245_v59 }

</bundles_post_ra>
